<compile_context>
chip_gen: v6e
topology: v6e:2x2x1
jax: 0.10.0
libtpu: 0.0.40
codegen_flags: <defaults>
</compile_context>

<pallas_src>
import functools

import jax
import jax.numpy as jnp
import numpy as np
from jax.experimental import pallas as pl
from jax.experimental.pallas import tpu as pltpu


# contract the LAST dim of both operands:  x @ y.T  (lane-dense (1, M) results)
NT_DIM_NUMBERS = (((1,), (1,)), ((), ()))


# ---------------------------------------------------------------------------
# Fused Pallas kernel: whole forward pass for one group of G graphs.
# Row index inside a group is r = i*G + g   (node-major, graph-minor).
# ---------------------------------------------------------------------------

def fused_gcn_ae_kernel(
    a_ref, x_ref,
    w1_ref, b1_ref, w2_ref, b2_ref, w3_ref, b3_ref,
    benc_ref, be_ref, mske_ref, ppool_ref, rpool_ref,
    wd_ref, bd_ref, prep_ref, mskd_ref, rd_ref,
    w4_ref, b4_ref, w5_ref, b5_ref, w6t_ref, b6_ref,
    o_ref,
):
    f32 = jnp.float32
    a = a_ref[0]                                   # (M, M) block-diag adjacency
    h = x_ref[0]                                   # (M, F)

    def gcn(h, w, b):
        # PyG GCNConv:  A_hat @ (X @ W) + b   (f32 MXU accumulation)
        hw = jnp.dot(h, w, preferred_element_type=f32)
        return jnp.dot(a, hw, preferred_element_type=f32) + b

    # --- conv1 -> ReLU -> conv2 -> ReLU -> conv3 -----------------------------
    h = jnp.maximum(gcn(h, w1_ref[...], b1_ref[...]), 0.0)
    h = jnp.maximum(gcn(h, w2_ref[...], b2_ref[...]), 0.0)
    h = gcn(h, w3_ref[...], b3_ref[...])                          # (M, emb2)

    # --- encoder:  x.view(-1, n*emb2) @ We + be  ------------------------------
    # Relayout-as-matmul:  enc[g, l] = sum_{i,j} h[i*G+g, j] * We[i*emb2+j, l].
    #   benc[j, i*latent+l] = We[i*emb2+j, l]
    #   mske keeps only the i'==i lane block of each row
    #   ppool sums a graph's n node rows, rpool collapses the n lane blocks.
    y = jnp.dot(h, benc_ref[...], preferred_element_type=f32) * mske_ref[...]
    enc = jnp.dot(jnp.dot(ppool_ref[...], y, preferred_element_type=f32),
                  rpool_ref[...], preferred_element_type=f32) \
        + be_ref[...]                                             # (G, latent)

    # --- decoder: ReLU((enc @ Wd + bd).view(-1, emb3)) ------------------------
    # prep replicates enc to all n node rows; mskd/rd pick each row's own
    # emb3-wide slice of the (n*emb3)-wide decoder output.
    z = jnp.dot(prep_ref[...],
                jnp.dot(enc, wd_ref[...], preferred_element_type=f32),
                preferred_element_type=f32) + bd_ref[...]         # (M, n*emb3)
    h = jnp.maximum(
        jnp.dot(z * mskd_ref[...], rd_ref[...], preferred_element_type=f32),
        0.0)                                                      # (M, emb3)

    # --- conv4 -> ReLU -> conv5 -> ReLU --------------------------------------
    h = jnp.maximum(gcn(h, w4_ref[...], b4_ref[...]), 0.0)
    h = jnp.maximum(gcn(h, w5_ref[...], b5_ref[...]), 0.0)        # (M, emb5)

    # --- conv6 + sigmoid in transposed (row) form: lane-dense (1, M) output ---
    hw6_row = jax.lax.dot_general(w6t_ref[...], h, NT_DIM_NUMBERS,
                                  preferred_element_type=f32)     # (1, M)
    out_row = jax.lax.dot_general(hw6_row, a, NT_DIM_NUMBERS,
                                  preferred_element_type=f32)     # (1, M)
    o_ref[0] = jax.nn.sigmoid(out_row + b6_ref[...])


# ---------------------------------------------------------------------------
# pallas_call wrapper (grid over graph groups; weights resident in VMEM)
# ---------------------------------------------------------------------------

def _pick_graphs_per_step(num_nodes, batch_size, target_rows=128):
    """Pick G so G*num_nodes ~= target_rows (128 fills the MXU M dim on v5e;
    use target_rows=256 on v6e/v7x if the batch allows), G divides the batch,
    and the grid keeps >=2 steps when possible (v7x megacore)."""
    g = max(1, min(batch_size, max(1, target_rows // max(num_nodes, 1))))
    while g > 1 and (batch_size % g != 0 or batch_size // g < 2):
        g -= 1
    return g


@functools.partial(jax.jit,
                   static_argnames=("num_nodes", "batch_size", "graphs_per_step"))
def model3_variant6_forward(params, x, a_blocks, num_nodes, batch_size,
                            graphs_per_step=None, batch_index=None):
    del batch_index                      # unused by the reference forward pass
    n = num_nodes
    f_in = x.shape[-1]
    emb2 = params["w3"].shape[1]
    emb3 = params["w4"].shape[0]
    latent = params["we"].shape[1]

    if graphs_per_step is None:
        graphs_per_step = _pick_graphs_per_step(n, batch_size)
    G = graphs_per_step
    assert batch_size % G == 0, (batch_size, G)
    num_groups = batch_size // G
    M = G * n
    f32 = jnp.float32

    # ----- layout plumbing (wrapper-side, free) -------------------------------
    # rows inside a group are node-major / graph-minor:  r = i*G + g
    x_perm = (x.reshape(num_groups, G, n, f_in)
               .transpose(0, 2, 1, 3)
               .reshape(num_groups, M, f_in).astype(f32))
    blocks = a_blocks.reshape(num_groups, G, n, n).astype(f32)
    a_perm = jnp.einsum("kgij,gh->kigjh", blocks, jnp.eye(G, dtype=f32))
    a_perm = a_perm.reshape(num_groups, M, M)

    # constant relayout matrices (turn the two .view ops into matmuls)
    benc = (params["we"].reshape(n, emb2, latent)
            .transpose(1, 0, 2).reshape(emb2, n * latent))
    mske = jnp.kron(jnp.eye(n, dtype=f32), jnp.ones((G, latent), f32))
    ppool = jnp.kron(jnp.ones((1, n), f32), jnp.eye(G, dtype=f32))
    rpool = jnp.kron(jnp.ones((n, 1), f32), jnp.eye(latent, dtype=f32))
    prep = ppool.T
    mskd = jnp.kron(jnp.eye(n, dtype=f32), jnp.ones((G, emb3), f32))
    rd = jnp.kron(jnp.ones((n, 1), f32), jnp.eye(emb3, dtype=f32))
    w6t = params["w6"].T                                          # (1, emb5)

    args = (a_perm, x_perm,
            params["w1"], params["b1"], params["w2"], params["b2"],
            params["w3"], params["b3"],
            benc, params["be"], mske, ppool, rpool,
            params["wd"], params["bd"], prep, mskd, rd,
            params["w4"], params["b4"], params["w5"], params["b5"],
            w6t, params["b6"])

    def per_group_spec(arr):
        return pl.BlockSpec((1,) + arr.shape[1:], lambda k: (k, 0, 0))

    def resident_spec(arr):              # whole array, constant block index
        zeros = (0,) * arr.ndim
        return pl.BlockSpec(arr.shape, lambda k, _z=zeros: _z)

    in_specs = [per_group_spec(a_perm), per_group_spec(x_perm)]
    in_specs += [resident_spec(w) for w in args[2:]]

    out = pl.pallas_call(
        fused_gcn_ae_kernel,
        grid=(num_groups,),
        out_shape=jax.ShapeDtypeStruct((num_groups, 1, M), f32),
        in_specs=in_specs,
        out_specs=pl.BlockSpec((1, 1, M), lambda k: (k, 0, 0)),
        compiler_params=pltpu.CompilerParams(
            dimension_semantics=("parallel",)),     # megacore-shard on v7x
    )(*args)

    # undo the node-major/graph-minor row permutation -> (batch, num_nodes)
    return (out.reshape(num_groups, n, G)
               .transpose(0, 2, 1)
               .reshape(batch_size, n))


# ---------------------------------------------------------------------------
# Model glue: parameters, adjacency normalization, pure-JAX reference
# ---------------------------------------------------------------------------

def init_params(key, num_nodes, num_features, emb, latent_dim):
    """Deterministic parameter initialization (glorot-ish scaled normals)."""
    def linear(k, fan_in, fan_out):
        kw, _ = jax.random.split(k)
        scale = (2.0 / (fan_in + fan_out)) ** 0.5
        w = scale * jax.random.normal(kw, (fan_in, fan_out), jnp.float32)
        b = jnp.zeros((1, fan_out), jnp.float32)
        return w, b

    keys = jax.random.split(key, 8)
    p = {}
    p["w1"], p["b1"] = linear(keys[0], num_features, emb[0])
    p["w2"], p["b2"] = linear(keys[1], emb[0], emb[1])
    p["w3"], p["b3"] = linear(keys[2], emb[1], emb[2])
    p["we"], p["be"] = linear(keys[3], num_nodes * emb[2], latent_dim)
    p["wd"], p["bd"] = linear(keys[4], latent_dim, num_nodes * emb[3])
    p["w4"], p["b4"] = linear(keys[5], emb[3], emb[4])
    p["w5"], p["b5"] = linear(keys[6], emb[4], emb[5])
    p["w6"], p["b6"] = linear(keys[7], emb[5], 1)
    return p


def normalized_adjacency_dense(edge_index, n_total):
    """Dense D^{-1/2}(A+I)D^{-1/2} from a COO edge_index [2, E]."""
    a = jnp.zeros((n_total, n_total), jnp.float32)
    a = a.at[edge_index[0], edge_index[1]].set(1.0)
    a = a + jnp.eye(n_total, dtype=jnp.float32)          # add self-loops
    deg = jnp.sum(a, axis=1)
    d_inv_sqrt = jnp.where(deg > 0, 1.0 / jnp.sqrt(deg), 0.0)
    return a * d_inv_sqrt[:, None] * d_inv_sqrt[None, :]


def adjacency_diag_blocks(a_full, batch_size, num_nodes):
    """Per-graph diagonal blocks [B, n, n] of a PyG-style batched adjacency
    (edges never cross graphs, so off-diagonal blocks are zero)."""
    a4 = a_full.reshape(batch_size, num_nodes, batch_size, num_nodes)
    idx = jnp.arange(batch_size)
    return a4[idx, :, idx, :]


def reference_forward(params, x, a_full, num_nodes, batch_size):
    """Pure-JAX reference with the ORIGINAL dense batched adjacency."""
    hp = "highest"

    def gcn(h, w, b):
        return jnp.dot(a_full, jnp.dot(h, w, precision=hp), precision=hp) + b

    h = jax.nn.relu(gcn(x, params["w1"], params["b1"]))
    h = jax.nn.relu(gcn(h, params["w2"], params["b2"]))
    h = gcn(h, params["w3"], params["b3"])
    z = h.reshape(batch_size, -1)
    enc = jnp.dot(z, params["we"], precision=hp) + params["be"]
    dec = jax.nn.relu(jnp.dot(enc, params["wd"], precision=hp) + params["bd"])
    h = dec.reshape(batch_size * num_nodes, -1)
    h = jax.nn.relu(gcn(h, params["w4"], params["b4"]))
    h = jax.nn.relu(gcn(h, params["w5"], params["b5"]))
    h = jax.nn.sigmoid(gcn(h, params["w6"], params["b6"]))
    return h.reshape(batch_size, num_nodes)


# ---------------------------------------------------------------------------
# Demo
# ---------------------------------------------------------------------------

if __name__ == "__main__":
    num_nodes = 8
    num_features = 4
    embedding_sequence = (16, 16, 8, 8, 16, 16)
    latent_space_dim = 32
    batch_size = 32            # -> G=16 graphs/step, M=128 rows, 2 grid steps
    n_total = batch_size * num_nodes

    key = jax.random.PRNGKey(0)
    k_param, k_x = jax.random.split(key)

    params = init_params(k_param, num_nodes, num_features,
                         embedding_sequence, latent_space_dim)

    # Node features for the batched graph: [batch * num_nodes, num_features]
    x = jax.random.normal(k_x, (n_total, num_features), jnp.float32)

    # Batched edge_index: a ring graph per sample, block-diagonal over batch.
    src, dst = [], []
    for b in range(batch_size):
        off = b * num_nodes
        for i in range(num_nodes):
            j = (i + 1) % num_nodes
            src += [off + i, off + j]
            dst += [off + j, off + i]
    edge_index = jnp.array([src, dst], dtype=jnp.int32)
    batch_index = jnp.repeat(jnp.arange(batch_size, dtype=jnp.int32), num_nodes)

    a_full = normalized_adjacency_dense(edge_index, n_total)
    a_blocks = adjacency_diag_blocks(a_full, batch_size, num_nodes)

    out = model3_variant6_forward(params, x, a_blocks, num_nodes, batch_size,
                                  batch_index=batch_index)
    out = jax.block_until_ready(out)

    ref = reference_forward(params, x, a_full, num_nodes, batch_size)

    assert out.shape == (batch_size, num_nodes)
    assert bool(jnp.all(jnp.isfinite(out)))
    assert bool(jnp.all((out >= 0.0) & (out <= 1.0)))
    err = float(np.max(np.abs(np.asarray(out) - np.asarray(ref))))
    assert np.allclose(np.asarray(out), np.asarray(ref),
                       rtol=2e-4, atol=2e-5), err
    print("KERNEL_OK")
</pallas_src>

<mosaic_0001>
module attributes {stable_mosaic.version = 11 : i64} {
  func.func @fused_gcn_ae_kernel(%arg0: i32, %arg1: memref<1x128x128xf32, #tpu.memory_space<vmem>>, %arg2: memref<1x128x4xf32, #tpu.memory_space<vmem>>, %arg3: memref<4x16xf32, #tpu.memory_space<vmem>>, %arg4: memref<1x16xf32, #tpu.memory_space<vmem>>, %arg5: memref<16x16xf32, #tpu.memory_space<vmem>>, %arg6: memref<1x16xf32, #tpu.memory_space<vmem>>, %arg7: memref<16x8xf32, #tpu.memory_space<vmem>>, %arg8: memref<1x8xf32, #tpu.memory_space<vmem>>, %arg9: memref<8x256xf32, #tpu.memory_space<vmem>>, %arg10: memref<1x32xf32, #tpu.memory_space<vmem>>, %arg11: memref<128x256xf32, #tpu.memory_space<vmem>>, %arg12: memref<16x128xf32, #tpu.memory_space<vmem>>, %arg13: memref<256x32xf32, #tpu.memory_space<vmem>>, %arg14: memref<32x64xf32, #tpu.memory_space<vmem>>, %arg15: memref<1x64xf32, #tpu.memory_space<vmem>>, %arg16: memref<128x16xf32, #tpu.memory_space<vmem>>, %arg17: memref<128x64xf32, #tpu.memory_space<vmem>>, %arg18: memref<64x8xf32, #tpu.memory_space<vmem>>, %arg19: memref<8x16xf32, #tpu.memory_space<vmem>>, %arg20: memref<1x16xf32, #tpu.memory_space<vmem>>, %arg21: memref<16x16xf32, #tpu.memory_space<vmem>>, %arg22: memref<1x16xf32, #tpu.memory_space<vmem>>, %arg23: memref<1x16xf32, #tpu.memory_space<vmem>>, %arg24: memref<1x1xf32, #tpu.memory_space<vmem>>, %arg25: memref<1x1x128xf32, #tpu.memory_space<vmem>>) attributes {dimension_semantics = [#tpu.dimension_semantics<parallel>], iteration_bounds = array<i64: 2>, scalar_prefetch = 0 : i64, scratch_operands = 0 : i64, tpu.core_type = #tpu.core_type<tc>, window_params = [{transform_indices = @transform_0, window_bounds = array<i64: 1, 128, 128>}, {transform_indices = @transform_1, window_bounds = array<i64: 1, 128, 4>}, {pipeline_mode = #tpu.pipeline_mode<synchronous>, transform_indices = @transform_2, window_bounds = array<i64: 4, 16>}, {pipeline_mode = #tpu.pipeline_mode<synchronous>, transform_indices = @transform_3, window_bounds = array<i64: 1, 16>}, {pipeline_mode = #tpu.pipeline_mode<synchronous>, transform_indices = @transform_4, window_bounds = array<i64: 16, 16>}, {pipeline_mode = #tpu.pipeline_mode<synchronous>, transform_indices = @transform_5, window_bounds = array<i64: 1, 16>}, {pipeline_mode = #tpu.pipeline_mode<synchronous>, transform_indices = @transform_6, window_bounds = array<i64: 16, 8>}, {pipeline_mode = #tpu.pipeline_mode<synchronous>, transform_indices = @transform_7, window_bounds = array<i64: 1, 8>}, {pipeline_mode = #tpu.pipeline_mode<synchronous>, transform_indices = @transform_8, window_bounds = array<i64: 8, 256>}, {pipeline_mode = #tpu.pipeline_mode<synchronous>, transform_indices = @transform_9, window_bounds = array<i64: 1, 32>}, {pipeline_mode = #tpu.pipeline_mode<synchronous>, transform_indices = @transform_10, window_bounds = array<i64: 128, 256>}, {pipeline_mode = #tpu.pipeline_mode<synchronous>, transform_indices = @transform_11, window_bounds = array<i64: 16, 128>}, {pipeline_mode = #tpu.pipeline_mode<synchronous>, transform_indices = @transform_12, window_bounds = array<i64: 256, 32>}, {pipeline_mode = #tpu.pipeline_mode<synchronous>, transform_indices = @transform_13, window_bounds = array<i64: 32, 64>}, {pipeline_mode = #tpu.pipeline_mode<synchronous>, transform_indices = @transform_14, window_bounds = array<i64: 1, 64>}, {pipeline_mode = #tpu.pipeline_mode<synchronous>, transform_indices = @transform_15, window_bounds = array<i64: 128, 16>}, {pipeline_mode = #tpu.pipeline_mode<synchronous>, transform_indices = @transform_16, window_bounds = array<i64: 128, 64>}, {pipeline_mode = #tpu.pipeline_mode<synchronous>, transform_indices = @transform_17, window_bounds = array<i64: 64, 8>}, {pipeline_mode = #tpu.pipeline_mode<synchronous>, transform_indices = @transform_18, window_bounds = array<i64: 8, 16>}, {pipeline_mode = #tpu.pipeline_mode<synchronous>, transform_indices = @transform_19, window_bounds = array<i64: 1, 16>}, {pipeline_mode = #tpu.pipeline_mode<synchronous>, transform_indices = @transform_20, window_bounds = array<i64: 16, 16>}, {pipeline_mode = #tpu.pipeline_mode<synchronous>, transform_indices = @transform_21, window_bounds = array<i64: 1, 16>}, {pipeline_mode = #tpu.pipeline_mode<synchronous>, transform_indices = @transform_22, window_bounds = array<i64: 1, 16>}, {pipeline_mode = #tpu.pipeline_mode<synchronous>, transform_indices = @transform_23, window_bounds = array<i64: 1, 1>}, {transform_indices = @transform_24, window_bounds = array<i64: 1, 1, 128>}]} {
    %c0 = arith.constant 0 : index
    %c0_0 = arith.constant 0 : index
    %c0_1 = arith.constant 0 : index
    %0 = vector.load %arg1[%c0, %c0_0, %c0_1] : memref<1x128x128xf32, #tpu.memory_space<vmem>>, vector<1x128x128xf32>
    %1 = vector.shape_cast %0 : vector<1x128x128xf32> to vector<128x128xf32>
    %c0_2 = arith.constant 0 : index
    %c0_3 = arith.constant 0 : index
    %c0_4 = arith.constant 0 : index
    %2 = vector.load %arg2[%c0_2, %c0_3, %c0_4] : memref<1x128x4xf32, #tpu.memory_space<vmem>>, vector<1x128x4xf32>
    %3 = vector.shape_cast %2 : vector<1x128x4xf32> to vector<128x4xf32>
    %c0_5 = arith.constant 0 : index
    %c0_6 = arith.constant 0 : index
    %4 = vector.load %arg3[%c0_5, %c0_6] : memref<4x16xf32, #tpu.memory_space<vmem>>, vector<4x16xf32>
    %c0_7 = arith.constant 0 : index
    %c0_8 = arith.constant 0 : index
    %5 = vector.load %arg4[%c0_7, %c0_8] : memref<1x16xf32, #tpu.memory_space<vmem>>, vector<1x16xf32>
    %cst = arith.constant dense<0.000000e+00> : vector<128x16xf32>
    %6 = tpu.matmul %3, %4, %cst {dimension_numbers = #tpu.dot_dimension_numbers<[1], [0], [0], [1], [0, 0, 1, 1], [], []>} : vector<128x4xf32>, vector<4x16xf32>, vector<128x16xf32> -> vector<128x16xf32>
    %cst_9 = arith.constant dense<0.000000e+00> : vector<128x16xf32>
    %7 = tpu.matmul %1, %6, %cst_9 {dimension_numbers = #tpu.dot_dimension_numbers<[1], [0], [0], [1], [0, 0, 1, 1], [], []>} : vector<128x128xf32>, vector<128x16xf32>, vector<128x16xf32> -> vector<128x16xf32>
    %8 = vector.broadcast %5 : vector<1x16xf32> to vector<128x16xf32>
    %9 = arith.addf %7, %8 : vector<128x16xf32>
    %cst_10 = arith.constant 0.000000e+00 : f32
    %10 = vector.broadcast %cst_10 : f32 to vector<128x16xf32>
    %11 = arith.maximumf %9, %10 : vector<128x16xf32>
    %c0_11 = arith.constant 0 : index
    %c0_12 = arith.constant 0 : index
    %12 = vector.load %arg5[%c0_11, %c0_12] : memref<16x16xf32, #tpu.memory_space<vmem>>, vector<16x16xf32>
    %c0_13 = arith.constant 0 : index
    %c0_14 = arith.constant 0 : index
    %13 = vector.load %arg6[%c0_13, %c0_14] : memref<1x16xf32, #tpu.memory_space<vmem>>, vector<1x16xf32>
    %cst_15 = arith.constant dense<0.000000e+00> : vector<128x16xf32>
    %14 = tpu.matmul %11, %12, %cst_15 {dimension_numbers = #tpu.dot_dimension_numbers<[1], [0], [0], [1], [0, 0, 1, 1], [], []>} : vector<128x16xf32>, vector<16x16xf32>, vector<128x16xf32> -> vector<128x16xf32>
    %cst_16 = arith.constant dense<0.000000e+00> : vector<128x16xf32>
    %15 = tpu.matmul %1, %14, %cst_16 {dimension_numbers = #tpu.dot_dimension_numbers<[1], [0], [0], [1], [0, 0, 1, 1], [], []>} : vector<128x128xf32>, vector<128x16xf32>, vector<128x16xf32> -> vector<128x16xf32>
    %16 = vector.broadcast %13 : vector<1x16xf32> to vector<128x16xf32>
    %17 = arith.addf %15, %16 : vector<128x16xf32>
    %cst_17 = arith.constant 0.000000e+00 : f32
    %18 = vector.broadcast %cst_17 : f32 to vector<128x16xf32>
    %19 = arith.maximumf %17, %18 : vector<128x16xf32>
    %c0_18 = arith.constant 0 : index
    %c0_19 = arith.constant 0 : index
    %20 = vector.load %arg7[%c0_18, %c0_19] : memref<16x8xf32, #tpu.memory_space<vmem>>, vector<16x8xf32>
    %c0_20 = arith.constant 0 : index
    %c0_21 = arith.constant 0 : index
    %21 = vector.load %arg8[%c0_20, %c0_21] : memref<1x8xf32, #tpu.memory_space<vmem>>, vector<1x8xf32>
    %cst_22 = arith.constant dense<0.000000e+00> : vector<128x8xf32>
    %22 = tpu.matmul %19, %20, %cst_22 {dimension_numbers = #tpu.dot_dimension_numbers<[1], [0], [0], [1], [0, 0, 1, 1], [], []>} : vector<128x16xf32>, vector<16x8xf32>, vector<128x8xf32> -> vector<128x8xf32>
    %cst_23 = arith.constant dense<0.000000e+00> : vector<128x8xf32>
    %23 = tpu.matmul %1, %22, %cst_23 {dimension_numbers = #tpu.dot_dimension_numbers<[1], [0], [0], [1], [0, 0, 1, 1], [], []>} : vector<128x128xf32>, vector<128x8xf32>, vector<128x8xf32> -> vector<128x8xf32>
    %24 = vector.broadcast %21 : vector<1x8xf32> to vector<128x8xf32>
    %25 = arith.addf %23, %24 : vector<128x8xf32>
    %c0_24 = arith.constant 0 : index
    %c0_25 = arith.constant 0 : index
    %26 = vector.load %arg9[%c0_24, %c0_25] : memref<8x256xf32, #tpu.memory_space<vmem>>, vector<8x256xf32>
    %cst_26 = arith.constant dense<0.000000e+00> : vector<128x256xf32>
    %27 = tpu.matmul %25, %26, %cst_26 {dimension_numbers = #tpu.dot_dimension_numbers<[1], [0], [0], [1], [0, 0, 1, 1], [], []>} : vector<128x8xf32>, vector<8x256xf32>, vector<128x256xf32> -> vector<128x256xf32>
    %c0_27 = arith.constant 0 : index
    %c0_28 = arith.constant 0 : index
    %28 = vector.load %arg11[%c0_27, %c0_28] : memref<128x256xf32, #tpu.memory_space<vmem>>, vector<128x256xf32>
    %29 = arith.mulf %27, %28 : vector<128x256xf32>
    %c0_29 = arith.constant 0 : index
    %c0_30 = arith.constant 0 : index
    %30 = vector.load %arg12[%c0_29, %c0_30] : memref<16x128xf32, #tpu.memory_space<vmem>>, vector<16x128xf32>
    %cst_31 = arith.constant dense<0.000000e+00> : vector<16x256xf32>
    %31 = tpu.matmul %30, %29, %cst_31 {dimension_numbers = #tpu.dot_dimension_numbers<[1], [0], [0], [1], [0, 0, 1, 1], [], []>} : vector<16x128xf32>, vector<128x256xf32>, vector<16x256xf32> -> vector<16x256xf32>
    %c0_32 = arith.constant 0 : index
    %c0_33 = arith.constant 0 : index
    %32 = vector.load %arg13[%c0_32, %c0_33] : memref<256x32xf32, #tpu.memory_space<vmem>>, vector<256x32xf32>
    %cst_34 = arith.constant dense<0.000000e+00> : vector<16x32xf32>
    %33 = tpu.matmul %31, %32, %cst_34 {dimension_numbers = #tpu.dot_dimension_numbers<[1], [0], [0], [1], [0, 0, 1, 1], [], []>} : vector<16x256xf32>, vector<256x32xf32>, vector<16x32xf32> -> vector<16x32xf32>
    %c0_35 = arith.constant 0 : index
    %c0_36 = arith.constant 0 : index
    %34 = vector.load %arg10[%c0_35, %c0_36] : memref<1x32xf32, #tpu.memory_space<vmem>>, vector<1x32xf32>
    %35 = vector.broadcast %34 : vector<1x32xf32> to vector<16x32xf32>
    %36 = arith.addf %33, %35 : vector<16x32xf32>
    %c0_37 = arith.constant 0 : index
    %c0_38 = arith.constant 0 : index
    %37 = vector.load %arg16[%c0_37, %c0_38] : memref<128x16xf32, #tpu.memory_space<vmem>>, vector<128x16xf32>
    %c0_39 = arith.constant 0 : index
    %c0_40 = arith.constant 0 : index
    %38 = vector.load %arg14[%c0_39, %c0_40] : memref<32x64xf32, #tpu.memory_space<vmem>>, vector<32x64xf32>
    %cst_41 = arith.constant dense<0.000000e+00> : vector<16x64xf32>
    %39 = tpu.matmul %36, %38, %cst_41 {dimension_numbers = #tpu.dot_dimension_numbers<[1], [0], [0], [1], [0, 0, 1, 1], [], []>} : vector<16x32xf32>, vector<32x64xf32>, vector<16x64xf32> -> vector<16x64xf32>
    %cst_42 = arith.constant dense<0.000000e+00> : vector<128x64xf32>
    %40 = tpu.matmul %37, %39, %cst_42 {dimension_numbers = #tpu.dot_dimension_numbers<[1], [0], [0], [1], [0, 0, 1, 1], [], []>} : vector<128x16xf32>, vector<16x64xf32>, vector<128x64xf32> -> vector<128x64xf32>
    %c0_43 = arith.constant 0 : index
    %c0_44 = arith.constant 0 : index
    %41 = vector.load %arg15[%c0_43, %c0_44] : memref<1x64xf32, #tpu.memory_space<vmem>>, vector<1x64xf32>
    %42 = vector.broadcast %41 : vector<1x64xf32> to vector<128x64xf32>
    %43 = arith.addf %40, %42 : vector<128x64xf32>
    %c0_45 = arith.constant 0 : index
    %c0_46 = arith.constant 0 : index
    %44 = vector.load %arg17[%c0_45, %c0_46] : memref<128x64xf32, #tpu.memory_space<vmem>>, vector<128x64xf32>
    %45 = arith.mulf %43, %44 : vector<128x64xf32>
    %c0_47 = arith.constant 0 : index
    %c0_48 = arith.constant 0 : index
    %46 = vector.load %arg18[%c0_47, %c0_48] : memref<64x8xf32, #tpu.memory_space<vmem>>, vector<64x8xf32>
    %cst_49 = arith.constant dense<0.000000e+00> : vector<128x8xf32>
    %47 = tpu.matmul %45, %46, %cst_49 {dimension_numbers = #tpu.dot_dimension_numbers<[1], [0], [0], [1], [0, 0, 1, 1], [], []>} : vector<128x64xf32>, vector<64x8xf32>, vector<128x8xf32> -> vector<128x8xf32>
    %cst_50 = arith.constant 0.000000e+00 : f32
    %48 = vector.broadcast %cst_50 : f32 to vector<128x8xf32>
    %49 = arith.maximumf %47, %48 : vector<128x8xf32>
    %c0_51 = arith.constant 0 : index
    %c0_52 = arith.constant 0 : index
    %50 = vector.load %arg19[%c0_51, %c0_52] : memref<8x16xf32, #tpu.memory_space<vmem>>, vector<8x16xf32>
    %c0_53 = arith.constant 0 : index
    %c0_54 = arith.constant 0 : index
    %51 = vector.load %arg20[%c0_53, %c0_54] : memref<1x16xf32, #tpu.memory_space<vmem>>, vector<1x16xf32>
    %cst_55 = arith.constant dense<0.000000e+00> : vector<128x16xf32>
    %52 = tpu.matmul %49, %50, %cst_55 {dimension_numbers = #tpu.dot_dimension_numbers<[1], [0], [0], [1], [0, 0, 1, 1], [], []>} : vector<128x8xf32>, vector<8x16xf32>, vector<128x16xf32> -> vector<128x16xf32>
    %cst_56 = arith.constant dense<0.000000e+00> : vector<128x16xf32>
    %53 = tpu.matmul %1, %52, %cst_56 {dimension_numbers = #tpu.dot_dimension_numbers<[1], [0], [0], [1], [0, 0, 1, 1], [], []>} : vector<128x128xf32>, vector<128x16xf32>, vector<128x16xf32> -> vector<128x16xf32>
    %54 = vector.broadcast %51 : vector<1x16xf32> to vector<128x16xf32>
    %55 = arith.addf %53, %54 : vector<128x16xf32>
    %cst_57 = arith.constant 0.000000e+00 : f32
    %56 = vector.broadcast %cst_57 : f32 to vector<128x16xf32>
    %57 = arith.maximumf %55, %56 : vector<128x16xf32>
    %c0_58 = arith.constant 0 : index
    %c0_59 = arith.constant 0 : index
    %58 = vector.load %arg21[%c0_58, %c0_59] : memref<16x16xf32, #tpu.memory_space<vmem>>, vector<16x16xf32>
    %c0_60 = arith.constant 0 : index
    %c0_61 = arith.constant 0 : index
    %59 = vector.load %arg22[%c0_60, %c0_61] : memref<1x16xf32, #tpu.memory_space<vmem>>, vector<1x16xf32>
    %cst_62 = arith.constant dense<0.000000e+00> : vector<128x16xf32>
    %60 = tpu.matmul %57, %58, %cst_62 {dimension_numbers = #tpu.dot_dimension_numbers<[1], [0], [0], [1], [0, 0, 1, 1], [], []>} : vector<128x16xf32>, vector<16x16xf32>, vector<128x16xf32> -> vector<128x16xf32>
    %cst_63 = arith.constant dense<0.000000e+00> : vector<128x16xf32>
    %61 = tpu.matmul %1, %60, %cst_63 {dimension_numbers = #tpu.dot_dimension_numbers<[1], [0], [0], [1], [0, 0, 1, 1], [], []>} : vector<128x128xf32>, vector<128x16xf32>, vector<128x16xf32> -> vector<128x16xf32>
    %62 = vector.broadcast %59 : vector<1x16xf32> to vector<128x16xf32>
    %63 = arith.addf %61, %62 : vector<128x16xf32>
    %cst_64 = arith.constant 0.000000e+00 : f32
    %64 = vector.broadcast %cst_64 : f32 to vector<128x16xf32>
    %65 = arith.maximumf %63, %64 : vector<128x16xf32>
    %c0_65 = arith.constant 0 : index
    %c0_66 = arith.constant 0 : index
    %66 = vector.load %arg23[%c0_65, %c0_66] : memref<1x16xf32, #tpu.memory_space<vmem>>, vector<1x16xf32>
    %cst_67 = arith.constant dense<0.000000e+00> : vector<1x128xf32>
    %67 = tpu.matmul %66, %65, %cst_67 {dimension_numbers = #tpu.dot_dimension_numbers<[1], [1], [0], [0], [0, 0, 1, 0], [], []>} : vector<1x16xf32>, vector<128x16xf32>, vector<1x128xf32> -> vector<1x128xf32>
    %cst_68 = arith.constant dense<0.000000e+00> : vector<1x128xf32>
    %68 = tpu.matmul %67, %1, %cst_68 {dimension_numbers = #tpu.dot_dimension_numbers<[1], [1], [0], [0], [0, 0, 1, 0], [], []>} : vector<1x128xf32>, vector<128x128xf32>, vector<1x128xf32> -> vector<1x128xf32>
    %c0_69 = arith.constant 0 : index
    %c0_70 = arith.constant 0 : index
    %69 = vector.load %arg24[%c0_69, %c0_70] : memref<1x1xf32, #tpu.memory_space<vmem>>, vector<1x1xf32>
    %70 = vector.broadcast %69 : vector<1x1xf32> to vector<1x128xf32>
    %71 = arith.addf %68, %70 : vector<1x128xf32>
    %72 = arith.negf %71 : vector<1x128xf32>
    %73 = math.exp %72 : vector<1x128xf32>
    %cst_71 = arith.constant 1.000000e+00 : f32
    %74 = vector.broadcast %cst_71 : f32 to vector<1x128xf32>
    %75 = arith.addf %74, %73 : vector<1x128xf32>
    %76 = arith.divf %74, %75 : vector<1x128xf32>
    %c0_72 = arith.constant 0 : index
    %c0_73 = arith.constant 0 : index
    %c0_74 = arith.constant 0 : index
    %77 = vector.load %arg25[%c0_72, %c0_73, %c0_74] : memref<1x1x128xf32, #tpu.memory_space<vmem>>, vector<1x1x128xf32>
    %78 = vector.shape_cast %77 : vector<1x1x128xf32> to vector<1x128xf32>
    %79 = vector.shape_cast %76 : vector<1x128xf32> to vector<1x1x128xf32>
    tpu.vector_store %arg25[%c0_72, %c0_73, %c0_74], %79 {strides = array<i32>} : memref<1x1x128xf32, #tpu.memory_space<vmem>>, vector<1x1x128xf32>,
    return
  }
  func.func @transform_0(%arg0: i32) -> (i32, i32, i32) {
    %c0_i32 = arith.constant 0 : i32
    %c0_i32_0 = arith.constant 0 : i32
    %c0_i32_1 = arith.constant 0 : i32
    return %arg0, %c0_i32, %c0_i32_0 : i32, i32, i32
  }
  func.func @transform_1(%arg0: i32) -> (i32, i32, i32) {
    %c0_i32 = arith.constant 0 : i32
    %c0_i32_0 = arith.constant 0 : i32
    %c0_i32_1 = arith.constant 0 : i32
    return %arg0, %c0_i32, %c0_i32_0 : i32, i32, i32
  }
  func.func @transform_2(%arg0: i32) -> (i32, i32) {
    %c0_i32 = arith.constant 0 : i32
    %c0_i32_0 = arith.constant 0 : i32
    %c0_i32_1 = arith.constant 0 : i32
    return %c0_i32, %c0_i32_0 : i32, i32
  }
  func.func @transform_3(%arg0: i32) -> (i32, i32) {
    %c0_i32 = arith.constant 0 : i32
    %c0_i32_0 = arith.constant 0 : i32
    %c0_i32_1 = arith.constant 0 : i32
    return %c0_i32, %c0_i32_0 : i32, i32
  }
  func.func @transform_4(%arg0: i32) -> (i32, i32) {
    %c0_i32 = arith.constant 0 : i32
    %c0_i32_0 = arith.constant 0 : i32
    %c0_i32_1 = arith.constant 0 : i32
    return %c0_i32, %c0_i32_0 : i32, i32
  }
  func.func @transform_5(%arg0: i32) -> (i32, i32) {
    %c0_i32 = arith.constant 0 : i32
    %c0_i32_0 = arith.constant 0 : i32
    %c0_i32_1 = arith.constant 0 : i32
    return %c0_i32, %c0_i32_0 : i32, i32
  }
  func.func @transform_6(%arg0: i32) -> (i32, i32) {
    %c0_i32 = arith.constant 0 : i32
    %c0_i32_0 = arith.constant 0 : i32
    %c0_i32_1 = arith.constant 0 : i32
    return %c0_i32, %c0_i32_0 : i32, i32
  }
  func.func @transform_7(%arg0: i32) -> (i32, i32) {
    %c0_i32 = arith.constant 0 : i32
    %c0_i32_0 = arith.constant 0 : i32
    %c0_i32_1 = arith.constant 0 : i32
    return %c0_i32, %c0_i32_0 : i32, i32
  }
  func.func @transform_8(%arg0: i32) -> (i32, i32) {
    %c0_i32 = arith.constant 0 : i32
    %c0_i32_0 = arith.constant 0 : i32
    %c0_i32_1 = arith.constant 0 : i32
    return %c0_i32, %c0_i32_0 : i32, i32
  }
  func.func @transform_9(%arg0: i32) -> (i32, i32) {
    %c0_i32 = arith.constant 0 : i32
    %c0_i32_0 = arith.constant 0 : i32
    %c0_i32_1 = arith.constant 0 : i32
    return %c0_i32, %c0_i32_0 : i32, i32
  }
  func.func @transform_10(%arg0: i32) -> (i32, i32) {
    %c0_i32 = arith.constant 0 : i32
    %c0_i32_0 = arith.constant 0 : i32
    %c0_i32_1 = arith.constant 0 : i32
    return %c0_i32, %c0_i32_0 : i32, i32
  }
  func.func @transform_11(%arg0: i32) -> (i32, i32) {
    %c0_i32 = arith.constant 0 : i32
    %c0_i32_0 = arith.constant 0 : i32
    %c0_i32_1 = arith.constant 0 : i32
    return %c0_i32, %c0_i32_0 : i32, i32
  }
  func.func @transform_12(%arg0: i32) -> (i32, i32) {
    %c0_i32 = arith.constant 0 : i32
    %c0_i32_0 = arith.constant 0 : i32
    %c0_i32_1 = arith.constant 0 : i32
    return %c0_i32, %c0_i32_0 : i32, i32
  }
  func.func @transform_13(%arg0: i32) -> (i32, i32) {
    %c0_i32 = arith.constant 0 : i32
    %c0_i32_0 = arith.constant 0 : i32
    %c0_i32_1 = arith.constant 0 : i32
    return %c0_i32, %c0_i32_0 : i32, i32
  }
  func.func @transform_14(%arg0: i32) -> (i32, i32) {
    %c0_i32 = arith.constant 0 : i32
    %c0_i32_0 = arith.constant 0 : i32
    %c0_i32_1 = arith.constant 0 : i32
    return %c0_i32, %c0_i32_0 : i32, i32
  }
  func.func @transform_15(%arg0: i32) -> (i32, i32) {
    %c0_i32 = arith.constant 0 : i32
    %c0_i32_0 = arith.constant 0 : i32
    %c0_i32_1 = arith.constant 0 : i32
    return %c0_i32, %c0_i32_0 : i32, i32
  }
  func.func @transform_16(%arg0: i32) -> (i32, i32) {
    %c0_i32 = arith.constant 0 : i32
    %c0_i32_0 = arith.constant 0 : i32
    %c0_i32_1 = arith.constant 0 : i32
    return %c0_i32, %c0_i32_0 : i32, i32
  }
  func.func @transform_17(%arg0: i32) -> (i32, i32) {
    %c0_i32 = arith.constant 0 : i32
    %c0_i32_0 = arith.constant 0 : i32
    %c0_i32_1 = arith.constant 0 : i32
    return %c0_i32, %c0_i32_0 : i32, i32
  }
  func.func @transform_18(%arg0: i32) -> (i32, i32) {
    %c0_i32 = arith.constant 0 : i32
    %c0_i32_0 = arith.constant 0 : i32
    %c0_i32_1 = arith.constant 0 : i32
    return %c0_i32, %c0_i32_0 : i32, i32
  }
  func.func @transform_19(%arg0: i32) -> (i32, i32) {
    %c0_i32 = arith.constant 0 : i32
    %c0_i32_0 = arith.constant 0 : i32
    %c0_i32_1 = arith.constant 0 : i32
    return %c0_i32, %c0_i32_0 : i32, i32
  }
  func.func @transform_20(%arg0: i32) -> (i32, i32) {
    %c0_i32 = arith.constant 0 : i32
    %c0_i32_0 = arith.constant 0 : i32
    %c0_i32_1 = arith.constant 0 : i32
    return %c0_i32, %c0_i32_0 : i32, i32
  }
  func.func @transform_21(%arg0: i32) -> (i32, i32) {
    %c0_i32 = arith.constant 0 : i32
    %c0_i32_0 = arith.constant 0 : i32
    %c0_i32_1 = arith.constant 0 : i32
    return %c0_i32, %c0_i32_0 : i32, i32
  }
  func.func @transform_22(%arg0: i32) -> (i32, i32) {
    %c0_i32 = arith.constant 0 : i32
    %c0_i32_0 = arith.constant 0 : i32
    %c0_i32_1 = arith.constant 0 : i32
    return %c0_i32, %c0_i32_0 : i32, i32
  }
  func.func @transform_23(%arg0: i32) -> (i32, i32) {
    %c0_i32 = arith.constant 0 : i32
    %c0_i32_0 = arith.constant 0 : i32
    %c0_i32_1 = arith.constant 0 : i32
    return %c0_i32, %c0_i32_0 : i32, i32
  }
  func.func @transform_24(%arg0: i32) -> (i32, i32, i32) {
    %c0_i32 = arith.constant 0 : i32
    %c0_i32_0 = arith.constant 0 : i32
    %c0_i32_1 = arith.constant 0 : i32
    return %arg0, %c0_i32, %c0_i32_0 : i32, i32, i32
  }
}

</mosaic_0001>

<bundles_post_ra>
// kernel: model3_variant6_forward.1
= control target key start
LH: loop header
LB: loop body
LE: loop exit
PB: predicated region body
PF: predicated region fallthrough
CT: control target
= control target key end

     0   :  { %s5153_s27 = smov 0   ;;  %s6052_s0 = inlined_call_operand.vmem [shape: f32[2,128,128], index: 0, kind: input, shape index: {}]   ;;  %s6053_s1 = inlined_call_operand.vmem [shape: f32[2,128,4], index: 1, kind: input, shape index: {}]   ;;  %s6054_s2 = inlined_call_operand.vmem [shape: f32[4,16], index: 2, kind: input, shape index: {}]   ;;  %s6055_s3 = inlined_call_operand.vmem [shape: f32[1,16], index: 3, kind: input, shape index: {}]   ;;  %s6056_s4 = inlined_call_operand.vmem [shape: f32[16,16], index: 4, kind: input, shape index: {}]   ;;  %s6057_s5 = inlined_call_operand.vmem [shape: f32[1,16], index: 5, kind: input, shape index: {}]   ;;  %s6058_s6 = inlined_call_operand.vmem [shape: f32[16,8], index: 6, kind: input, shape index: {}]   ;;  %s6059_s7 = inlined_call_operand.vmem [shape: f32[1,8], index: 7, kind: input, shape index: {}]   ;;  %s6060_s8 = inlined_call_operand.vmem [shape: f32[8,256], index: 8, kind: input, shape index: {}]   ;;  %s6061_s9 = inlined_call_operand.vmem [shape: f32[1,32], index: 9, kind: input, shape index: {}]   ;;  %s6062_s10 = inlined_call_operand.vmem [shape: f32[128,256], index: 10, kind: input, shape index: {}]   ;;  %s6063_s11 = inlined_call_operand.vmem [shape: f32[16,128], index: 11, kind: input, shape index: {}]   ;;  %s6064_s12 = inlined_call_operand.vmem [shape: f32[256,32], index: 12, kind: input, shape index: {}]   ;;  %s6065_s13 = inlined_call_operand.vmem [shape: f32[32,64], index: 13, kind: input, shape index: {}]   ;;  %s6066_s14 = inlined_call_operand.vmem [shape: f32[1,64], index: 14, kind: input, shape index: {}]   ;;  %s6067_s15 = inlined_call_operand.vmem [shape: f32[128,16], index: 15, kind: input, shape index: {}]   ;;  %s6068_s16 = inlined_call_operand.vmem [shape: f32[128,64], index: 16, kind: input, shape index: {}]   ;;  %s6069_s17 = inlined_call_operand.vmem [shape: f32[64,8], index: 17, kind: input, shape index: {}]   ;;  %s6070_s18 = inlined_call_operand.vmem [shape: f32[8,16], index: 18, kind: input, shape index: {}]   ;;  %s6071_s19 = inlined_call_operand.vmem [shape: f32[1,16], index: 19, kind: input, shape index: {}]   ;;  %s6072_s20 = inlined_call_operand.vmem [shape: f32[16,16], index: 20, kind: input, shape index: {}]   ;;  %s6073_s21 = inlined_call_operand.vmem [shape: f32[1,16], index: 21, kind: input, shape index: {}]   ;;  %s6074_s22 = inlined_call_operand.vmem [shape: f32[1,16], index: 22, kind: input, shape index: {}]   ;;  %s6075_s23 = inlined_call_operand.<no memory space> [shape: f32[1,1], index: 23, kind: input, shape index: {}]   ;;  %s6076_s24 = inlined_call_operand.vmem [shape: f32[2,1,128], index: 24, kind: output, shape index: {}]  }
   0x1   :  { %6080 = sst [smem:[#allocation3_spill]] %s6052_s0  ;;  %v29_v0 = vstv %s6075_s23 }
   0x2   :  { %6081 = sst [smem:[#allocation4_spill]] %s6053_s1  ;;  %30 = vst [vmem:[#allocation2] sm:$0x1] %v29_v0 }
   0x3   :  { %6082 = sst [smem:[#allocation5_spill]] %s6054_s2 }
   0x4   :  { %6083 = sst [smem:[#allocation6_spill]] %s6055_s3 }
   0x5   :  { %6084 = sst [smem:[#allocation7_spill]] %s6056_s4 }
   0x6   :  { %6085 = sst [smem:[#allocation8_spill]] %s6057_s5 }
   0x7   :  { %6086 = sst [smem:[#allocation9_spill]] %s6058_s6 }
   0x8   :  { %6087 = sst [smem:[#allocation10_spill]] %s6059_s7 }
   0x9   :  { %6088 = sst [smem:[#allocation11_spill]] %s6060_s8 }
   0xa LB: > { %s3880_s28 = sadd.s32 4294967295, %s5020_s27   ;;  %p3884_p0 = scmp.ge.s32.totalorder %s5020_s27, 1  ;;  %s5020_s27 = sphi %s5153_s27, %s36_s27  }
   0xb   : > { %p674_p1 = scmp.lt.s32.totalorder %s5020_s27, 3 }
   0xd   : > { %p675_p2 = pnand %p3884_p0, %p674_p1 }
   0xe   : > { %s6089_s29 = sld [smem:[#allocation5_spill]] (!%p675_p2)  ;;  %p743_p3 = scmp.lt.s32.totalorder (!%p675_p2), %s3880_s28, 1 }
   0xf   : > { %678 = sbr.rel (%p675_p2) target bundleno = 4079 (0xfef), region = 116  ;;  %s6090_s30 = sld [smem:[#allocation4_spill]] (!%p675_p2) }
  0x10   : > { %s6091_s4 = sld [smem:[#allocation3_spill]] (!%p675_p2) }
  0x11   : > { %s6092_s6 = sld [smem:[#allocation7_spill]] (!%p675_p2) }
  0x12   : > { %s6093_s7 = sld [smem:[#allocation6_spill]] (!%p675_p2) }
  0x13   : > { %s6094_s25 = sld [smem:[#allocation9_spill]] (!%p675_p2) }
  0x14   : > { %v788_v1 = vld [vmem:[%s6089_s29] sm:$0xf]  ;;  %vm839_vm0 = vcmask 1043456   ;;  %s6099_s28 = smov (!%p743_p3, %s3880_s28), 1  ;;  %vm790_vm1 = vcmask 31744   ;;  %vm1158_vm2 = vcmask 130048  }
  0x15   : > { %4417 = vmatprep.subr.msk.mxu1 %vm839_vm0, %v788_v1  ;;  %s4047_s23 = sshll.u32 %s6099_s28, 7  ;;  %s6095_s2 = sld [smem:[#allocation8_spill]]  ;;  %vm1868_vm3 = vcmask 64512   ;;  %vm2355_vm4 = vcmask 261120   ;;  %vm2677_vm5 = vcmask 523264   ;;  %vm5023_vm6 = vmmov 0  }
  0x16   : > { %4418 = vmatpush3.msk.msra.mxu1 %vm839_vm0, %v788_v1  ;;  %s5172_s3 = scalar_lea.vmem %s6090_s30, %s4047_s23  ;;  %s5211_s1 = scalar_lea.vmem %s6091_s4, %s4047_s23 }
  0x17   : > { %v772_v2 = vld [vmem:[%s5172_s3] sm:$0xff]  ;;  %v773_v3 = vld [vmem:[%s5172_s3 + $0x8] sm:$0xff]  ;;  %v774_v4 = vld [vmem:[%s5172_s3 + $0x10] sm:$0xff]  ;;  %s6096_s0 = sld [smem:[#allocation11_spill]] }
  0x18   : > { %4419 = vmatprep.mubr.msk.f32.mxu1 %vm790_vm1, %v772_v2  ;;  %v775_v5 = vld [vmem:[%s5172_s3 + $0x18] sm:$0xff]  ;;  %v776_v6 = vld [vmem:[%s5172_s3 + $0x20] sm:$0xff]  ;;  %v777_v7 = vld [vmem:[%s5172_s3 + $0x28] sm:$0xff]  ;;  %s6097_s4 = sld [smem:[#allocation10_spill]] }
  0x19   : > { %4420 = vmatmul.mubr.msk.f32.vlgmr.msra.gmra.mxu1 %vm790_vm1, %v773_v3  ;;  %v778_v8 = vld [vmem:[%s5172_s3 + $0x30] sm:$0xff]  ;;  %v779_v9 = vld [vmem:[%s5172_s3 + $0x38] sm:$0xff]  ;;  %v780_v10 = vld [vmem:[%s5172_s3 + $0x40] sm:$0xff] }
  0x1a   : > { %4422 = vmatprep.mubr.msk.f32.mxu1 %vm790_vm1, %v774_v4  ;;  %v781_v11 = vld [vmem:[%s5172_s3 + $0x48] sm:$0xff]  ;;  %v782_v12 = vld [vmem:[%s5172_s3 + $0x50] sm:$0xff]  ;;  %v783_v13 = vld [vmem:[%s5172_s3 + $0x58] sm:$0xff] }
  0x1b   : > { %v784_v14 = vld [vmem:[%s5172_s3 + $0x60] sm:$0xff]  ;;  %v785_v15 = vld [vmem:[%s5172_s3 + $0x68] sm:$0xff]  ;;  %v786_v16 = vld [vmem:[%s5172_s3 + $0x70] sm:$0xff] }
  0x1c   : > { %v787_v17 = vld [vmem:[%s5172_s3 + $0x78] sm:$0xff]  ;;  %v5214_v18 = vld [vmem:[%s5211_s1] sm:$0xff]  ;;  %v5218_v35 = vld [vmem:[%s5211_s1 + $0x8] sm:$0xff]  ;;  %s755_s3 = scalar_lea.vmem %s6076_s24, %s6099_s28 }
  0x1d   : > { %4423 = vmatmul.mubr.msk.f32.gmra.mxu1 %vm790_vm1, %v775_v5  ;;  %v5221_v36 = vld [vmem:[%s5211_s1 + $0x10] sm:$0xff]  ;;  %v5226_v37 = vld [vmem:[%s5211_s1 + $0x18] sm:$0xff]  ;;  %v5229_v38 = vld [vmem:[%s5211_s1 + $0x20] sm:$0xff] }
  0x1e   : > { %4425 = vmatprep.mubr.msk.f32.mxu1 %vm790_vm1, %v776_v6  ;;  %v5234_v39 = vld [vmem:[%s5211_s1 + $0x28] sm:$0xff]  ;;  %v5237_v40 = vld [vmem:[%s5211_s1 + $0x30] sm:$0xff]  ;;  %v5242_v41 = vld [vmem:[%s5211_s1 + $0x38] sm:$0xff] }
  0x1f   : > { %v5245_v42 = vld [vmem:[%s5211_s1 + $0x40] sm:$0xff]  ;;  %v5250_v43 = vld [vmem:[%s5211_s1 + $0x48] sm:$0xff]  ;;  %v5253_v44 = vld [vmem:[%s5211_s1 + $0x50] sm:$0xff] }
  0x20   : > { %v5258_v45 = vld [vmem:[%s5211_s1 + $0x58] sm:$0xff]  ;;  %v5261_v46 = vld [vmem:[%s5211_s1 + $0x60] sm:$0xff]  ;;  %v5266_v47 = vld [vmem:[%s5211_s1 + $0x68] sm:$0xff] }
  0x21   : > { %4426 = vmatmul.mubr.msk.f32.gmra.mxu1 %vm790_vm1, %v777_v7  ;;  %v5269_v48 = vld [vmem:[%s5211_s1 + $0x70] sm:$0xff]  ;;  %v5274_v49 = vld [vmem:[%s5211_s1 + $0x78] sm:$0xff]  ;;  %v1156_v50 = vld [vmem:[%s6092_s6 + $0x8] sm:$0xff] }
  0x22   : > { %4428 = vmatprep.mubr.msk.f32.mxu1 %vm790_vm1, %v778_v8  ;;  %4499 = vmatprep.subr.mxu0 %v1156_v50  ;;  %v1155_v51 = vld [vmem:[%s6092_s6] sm:$0xff] }
  0x23   : > { %4500 = vmatpush3.msra.mxu0 %v1156_v50  ;;  %v3906_v52 = vld [vmem:[%s6093_s7] ss:$0 sm:$0xff] }
  0x24   : > { %4501 = vmatprep.subr.mxu0 %v1155_v51 }
  0x25   : > { %4429 = vmatmul.mubr.msk.f32.gmra.mxu1 %vm790_vm1, %v779_v9  ;;  %4502 = vmatpush3.msra.mxu0 %v1155_v51 }
  0x26   : > { %4431 = vmatprep.mubr.msk.f32.mxu1 %vm790_vm1, %v780_v10 }
  0x29   : > { %4432 = vmatmul.mubr.msk.f32.gmra.mxu1 %vm790_vm1, %v781_v11 }
  0x2a   : > { %4434 = vmatprep.mubr.msk.f32.mxu1 %vm790_vm1, %v782_v12 }
  0x2d   : > { %4435 = vmatmul.mubr.msk.f32.gmra.mxu1 %vm790_vm1, %v783_v13 }
  0x2e   : > { %4437 = vmatprep.mubr.msk.f32.mxu1 %vm790_vm1, %v784_v14 }
  0x31   : > { %4438 = vmatmul.mubr.msk.f32.gmra.mxu1 %vm790_vm1, %v785_v15 }
  0x32   : > { %4440 = vmatprep.mubr.msk.f32.mxu1 %vm790_vm1, %v786_v16 }
  0x35   : > { %4441 = vmatmul.mubr.msk.f32.gmra.mxu1 %vm790_vm1, %v787_v17 }
  0x36   : > { %4475 = vmatprep.mubr.f32.mxu1 %v5214_v18 }
  0xd9   : > { %v4421_v19 = vpop.f32.mrf.mxu1 }
  0xdb   : > { %v909_v20 = vpop.f32.mrf.mxu1 }
  0xdd   : > { %v4424_v21 = vpop.f32.mrf.mxu1 }
  0xdf   : > { %v919_v22 = vpop.f32.mrf.mxu1 }
  0xe1   : > { %v4427_v23 = vpop.f32.mrf.mxu1 }
  0xe3   : > { %v929_v24 = vpop.f32.mrf.mxu1 }
  0xe5   : > { %v4430_v25 = vpop.f32.mrf.mxu1 }
  0xe7   : > { %v939_v26 = vpop.f32.mrf.mxu1 }
  0xe9   : > { %v4433_v27 = vpop.f32.mrf.mxu1 }
  0xeb   : > { %v949_v28 = vpop.f32.mrf.mxu1 }
  0xed   : > { %v4436_v29 = vpop.f32.mrf.mxu1 }
  0xef   : > { %v959_v30 = vpop.f32.mrf.mxu1 }
  0xf1   : > { %v4439_v31 = vpop.f32.mrf.mxu1 }
  0xf3   : > { %v969_v32 = vpop.f32.mrf.mxu1 }
  0xf5   : > { %v4442_v33 = vpop.f32.mrf.mxu1 }
  0xf6   : > { %4443 = vmatprep.subr.mxu1 %v4442_v33 }
  0xf7   : > { %v979_v34 = vpop.f32.mrf.mxu1  ;;  %4444 = vmatpush3.msra.mxu1 %v4442_v33 }
  0xf8   : > { %4445 = vmatprep.subr.mxu1 %v979_v34 }
  0xf9   : > { %4446 = vmatpush3.msra.mxu1 %v979_v34 }
  0xfa   : > { %4447 = vmatprep.subr.mxu1 %v4439_v31 }
  0xfb   : > { %4448 = vmatpush3.msra.mxu1 %v4439_v31 }
  0xfc   : > { %4449 = vmatprep.subr.mxu1 %v969_v32 }
  0xfd   : > { %4450 = vmatpush3.msra.mxu1 %v969_v32 }
  0xfe   : > { %4451 = vmatprep.subr.mxu1 %v4436_v29 }
  0xff   : > { %4452 = vmatpush3.msra.mxu1 %v4436_v29 }
 0x100   : > { %4453 = vmatprep.subr.mxu1 %v959_v30 }
 0x101   : > { %4454 = vmatpush3.msra.mxu1 %v959_v30 }
 0x102   : > { %4455 = vmatprep.subr.mxu1 %v4433_v27 }
 0x103   : > { %4456 = vmatpush3.msra.mxu1 %v4433_v27 }
 0x104   : > { %4457 = vmatprep.subr.mxu1 %v949_v28 }
 0x105   : > { %4458 = vmatpush3.msra.mxu1 %v949_v28 }
 0x106   : > { %4459 = vmatprep.subr.mxu1 %v4430_v25 }
 0x107   : > { %4460 = vmatpush3.msra.mxu1 %v4430_v25 }
 0x108   : > { %4461 = vmatprep.subr.mxu1 %v939_v26 }
 0x109   : > { %4462 = vmatpush3.msra.mxu1 %v939_v26 }
 0x10a   : > { %4463 = vmatprep.subr.mxu1 %v4427_v23 }
 0x10b   : > { %4464 = vmatpush3.msra.mxu1 %v4427_v23 }
 0x10c   : > { %4465 = vmatprep.subr.mxu1 %v929_v24 }
 0x10d   : > { %4466 = vmatpush3.msra.mxu1 %v929_v24 }
 0x10e   : > { %4467 = vmatprep.subr.mxu1 %v4424_v21 }
 0x10f   : > { %4468 = vmatpush3.msra.mxu1 %v4424_v21 }
 0x110   : > { %4469 = vmatprep.subr.mxu1 %v919_v22 }
 0x111   : > { %4470 = vmatpush3.msra.mxu1 %v919_v22 }
 0x112   : > { %4471 = vmatprep.subr.mxu1 %v4421_v19 }
 0x113   : > { %4472 = vmatpush3.msra.mxu1 %v4421_v19 }
 0x114   : > { %4473 = vmatprep.subr.mxu1 %v909_v20 }
 0x115   : > { %4474 = vmatpush3.msra.mxu1 %v909_v20 }
 0x116   : > { %4476 = vmatmul.mubr.f32.vlgmr.msra.gmra.mxu1 %v5218_v35 }
 0x117   : > { %4478 = vmatprep.mubr.f32.mxu1 %v5221_v36 }
 0x11a   : > { %4479 = vmatmul.mubr.f32.gmra.mxu1 %v5226_v37 }
 0x11b   : > { %4481 = vmatprep.mubr.f32.mxu1 %v5229_v38 }
 0x11e   : > { %4482 = vmatmul.mubr.f32.gmra.mxu1 %v5234_v39 }
 0x11f   : > { %4484 = vmatprep.mubr.f32.mxu1 %v5237_v40 }
 0x122   : > { %4485 = vmatmul.mubr.f32.gmra.mxu1 %v5242_v41 }
 0x123   : > { %4487 = vmatprep.mubr.f32.mxu1 %v5245_v42 }
 0x126   : > { %4488 = vmatmul.mubr.f32.gmra.mxu1 %v5250_v43 }
 0x127   : > { %4490 = vmatprep.mubr.f32.mxu1 %v5253_v44 }
 0x12a   : > { %4491 = vmatmul.mubr.f32.gmra.mxu1 %v5258_v45 }
 0x12b   : > { %4493 = vmatprep.mubr.f32.mxu1 %v5261_v46 }
 0x12e   : > { %4494 = vmatmul.mubr.f32.gmra.mxu1 %v5266_v47 }
 0x12f   : > { %4496 = vmatprep.mubr.f32.mxu1 %v5269_v48 }
 0x132   : > { %4497 = vmatmul.mubr.f32.gmra.mxu1 %v5274_v49 }
 0x133   : > { %4559 = vmatprep.mubr.f32.mxu1 %v5214_v18 }
 0x1d6   : > { %v4477_v53 = vpop.f32.mrf.mxu1 }
 0x1d7   : > { %v1066_v54 = vadd.f32 %v4477_v53, %v3906_v52 }
 0x1d8   : > { %v1060_v55 = vpop.f32.mrf.mxu1 }
 0x1d9   : > { %v1061_v56 = vadd.f32 %v3906_v52, %v1060_v55  ;;  %v1140_v59 = vmax.f32 %v1066_v54, 0.0 }
 0x1da   : > { %v4480_v57 = vpop.f32.mrf.mxu1 }
 0x1db   : > { %v1139_v58 = vmax.f32 %v1061_v56, 0.0  ;;  %v1076_v60 = vadd.f32 %v4480_v57, %v3906_v52 }
 0x1dc   : > { %v1070_v61 = vpop.f32.mrf.mxu1 }
 0x1dd   : > { %v1071_v62 = vadd.f32 %v3906_v52, %v1070_v61  ;;  %4503 = vmatprep.mubr.msk.f32.mxu0 %vm1158_vm2, %v1139_v58  ;;  %v1142_v1 = vmax.f32 %v1076_v60, 0.0 }
 0x1de   : > { %v4483_v63 = vpop.f32.mrf.mxu1  ;;  %4504 = vmatmul.mubr.msk.f32.vlgmr.msra.gmra.mxu0 %vm1158_vm2, %v1140_v59 }
 0x1df   : > { %v1141_v0 = vmax.f32 %v1071_v62, 0.0  ;;  %v1086_v2 = vadd.f32 %v4483_v63, %v3906_v52 }
 0x1e0   : > { %v1080_v3 = vpop.f32.mrf.mxu1 }
 0x1e1   : > { %v1081_v4 = vadd.f32 %v3906_v52, %v1080_v3  ;;  %4506 = vmatprep.mubr.msk.f32.mxu0 %vm1158_vm2, %v1141_v0  ;;  %v1144_v7 = vmax.f32 %v1086_v2, 0.0 }
 0x1e2   : > { %v4486_v5 = vpop.f32.mrf.mxu1  ;;  %4507 = vmatmul.mubr.msk.f32.gmra.mxu0 %vm1158_vm2, %v1142_v1 }
 0x1e3   : > { %v1143_v6 = vmax.f32 %v1081_v4, 0.0  ;;  %v1096_v8 = vadd.f32 %v4486_v5, %v3906_v52  ;;  %v1520_v5 = vld [vmem:[%s6094_s25 + $0x8] sm:$0xff] }
 0x1e4   : > { %v1090_v9 = vpop.f32.mrf.mxu1  ;;  %4583 = vmatprep.subr.mxu0 %v1520_v5 }
 0x1e5   : > { %v1091_v10 = vadd.f32 %v3906_v52, %v1090_v9  ;;  %4509 = vmatprep.mubr.msk.f32.mxu0 %vm1158_vm2, %v1143_v6  ;;  %v1146_v13 = vmax.f32 %v1096_v8, 0.0  ;;  %4584 = vmatpush3.msra.mxu0 %v1520_v5  ;;  %v1519_v6 = vld [vmem:[%s6094_s25] sm:$0xff] }
 0x1e6   : > { %v4489_v11 = vpop.f32.mrf.mxu1  ;;  %4510 = vmatmul.mubr.msk.f32.gmra.mxu0 %vm1158_vm2, %v1144_v7  ;;  %4585 = vmatprep.subr.mxu0 %v1519_v6  ;;  %v3923_v7 = vld [vmem:[%s6095_s2] ss:$0 sm:$0xff] }
 0x1e7   : > { %v1145_v12 = vmax.f32 %v1091_v10, 0.0  ;;  %v1106_v14 = vadd.f32 %v4489_v11, %v3906_v52  ;;  %4586 = vmatpush3.msra.mxu0 %v1519_v6 }
 0x1e8   : > { %v1100_v15 = vpop.f32.mrf.mxu1 }
 0x1e9   : > { %v1101_v16 = vadd.f32 %v3906_v52, %v1100_v15  ;;  %4512 = vmatprep.mubr.msk.f32.mxu0 %vm1158_vm2, %v1145_v12  ;;  %v1148_v20 = vmax.f32 %v1106_v14, 0.0 }
 0x1ea   : > { %v4492_v17 = vpop.f32.mrf.mxu1  ;;  %4513 = vmatmul.mubr.msk.f32.gmra.mxu0 %vm1158_vm2, %v1146_v13 }
 0x1eb   : > { %v1147_v19 = vmax.f32 %v1101_v16, 0.0  ;;  %v1116_v21 = vadd.f32 %v4492_v17, %v3906_v52 }
 0x1ec   : > { %v1110_v22 = vpop.f32.mrf.mxu1 }
 0x1ed   : > { %v1111_v23 = vadd.f32 %v3906_v52, %v1110_v22  ;;  %4515 = vmatprep.mubr.msk.f32.mxu0 %vm1158_vm2, %v1147_v19  ;;  %v1150_v26 = vmax.f32 %v1116_v21, 0.0 }
 0x1ee   : > { %v4495_v24 = vpop.f32.mrf.mxu1  ;;  %4516 = vmatmul.mubr.msk.f32.gmra.mxu0 %vm1158_vm2, %v1148_v20 }
 0x1ef   : > { %v1149_v25 = vmax.f32 %v1111_v23, 0.0  ;;  %v1126_v27 = vadd.f32 %v4495_v24, %v3906_v52 }
 0x1f0   : > { %v1120_v28 = vpop.f32.mrf.mxu1 }
 0x1f1   : > { %v1121_v29 = vadd.f32 %v3906_v52, %v1120_v28  ;;  %4518 = vmatprep.mubr.msk.f32.mxu0 %vm1158_vm2, %v1149_v25  ;;  %v1152_v32 = vmax.f32 %v1126_v27, 0.0 }
 0x1f2   : > { %v4498_v30 = vpop.f32.mrf.mxu1  ;;  %4519 = vmatmul.mubr.msk.f32.gmra.mxu0 %vm1158_vm2, %v1150_v26 }
 0x1f3   : > { %v1151_v31 = vmax.f32 %v1121_v29, 0.0  ;;  %v1136_v33 = vadd.f32 %v4498_v30, %v3906_v52 }
 0x1f4   : > { %v1130_v34 = vpop.f32.mrf.mxu1 }
 0x1f5   : > { %v1131_v50 = vadd.f32 %v3906_v52, %v1130_v34  ;;  %4521 = vmatprep.mubr.msk.f32.mxu0 %vm1158_vm2, %v1151_v31  ;;  %v1154_v53 = vmax.f32 %v1136_v33, 0.0 }
 0x1f6   : > { %4522 = vmatmul.mubr.msk.f32.gmra.mxu0 %vm1158_vm2, %v1152_v32 }
 0x1f7   : > { %v1153_v51 = vmax.f32 %v1131_v50, 0.0 }
 0x1f9   : > { %4524 = vmatprep.mubr.msk.f32.mxu0 %vm1158_vm2, %v1153_v51 }
 0x1fa   : > { %4525 = vmatmul.mubr.msk.f32.gmra.mxu0 %vm1158_vm2, %v1154_v53 }
 0x29e   : > { %v4505_v54 = vpop.f32.mrf.mxu0 }
 0x2a0   : > { %v1273_v55 = vpop.f32.mrf.mxu0 }
 0x2a2   : > { %v4508_v56 = vpop.f32.mrf.mxu0 }
 0x2a4   : > { %v1283_v57 = vpop.f32.mrf.mxu0 }
 0x2a6   : > { %v4511_v58 = vpop.f32.mrf.mxu0 }
 0x2a8   : > { %v1293_v59 = vpop.f32.mrf.mxu0 }
 0x2aa   : > { %v4514_v60 = vpop.f32.mrf.mxu0 }
 0x2ac   : > { %v1303_v61 = vpop.f32.mrf.mxu0 }
 0x2ae   : > { %v4517_v62 = vpop.f32.mrf.mxu0 }
 0x2b0   : > { %v1313_v52 = vpop.f32.mrf.mxu0 }
 0x2b2   : > { %v4520_v63 = vpop.f32.mrf.mxu0 }
 0x2b4   : > { %v1323_v0 = vpop.f32.mrf.mxu0 }
 0x2b6   : > { %v4523_v1 = vpop.f32.mrf.mxu0 }
 0x2b8   : > { %v1333_v2 = vpop.f32.mrf.mxu0 }
 0x2ba   : > { %v4526_v3 = vpop.f32.mrf.mxu0 }
 0x2bb   : > { %4527 = vmatprep.subr.mxu1 %v4526_v3 }
 0x2bc   : > { %v1343_v4 = vpop.f32.mrf.mxu0  ;;  %4528 = vmatpush3.msra.mxu1 %v4526_v3 }
 0x2bd   : > { %4529 = vmatprep.subr.mxu1 %v1343_v4 }
 0x2be   : > { %4530 = vmatpush3.msra.mxu1 %v1343_v4 }
 0x2bf   : > { %4531 = vmatprep.subr.mxu1 %v4523_v1 }
 0x2c0   : > { %4532 = vmatpush3.msra.mxu1 %v4523_v1 }
 0x2c1   : > { %4533 = vmatprep.subr.mxu1 %v1333_v2 }
 0x2c2   : > { %4534 = vmatpush3.msra.mxu1 %v1333_v2 }
 0x2c3   : > { %4535 = vmatprep.subr.mxu1 %v4520_v63 }
 0x2c4   : > { %4536 = vmatpush3.msra.mxu1 %v4520_v63 }
 0x2c5   : > { %4537 = vmatprep.subr.mxu1 %v1323_v0 }
 0x2c6   : > { %4538 = vmatpush3.msra.mxu1 %v1323_v0 }
 0x2c7   : > { %4539 = vmatprep.subr.mxu1 %v4517_v62 }
 0x2c8   : > { %4540 = vmatpush3.msra.mxu1 %v4517_v62 }
 0x2c9   : > { %4541 = vmatprep.subr.mxu1 %v1313_v52 }
 0x2ca   : > { %4542 = vmatpush3.msra.mxu1 %v1313_v52 }
 0x2cb   : > { %4543 = vmatprep.subr.mxu1 %v4514_v60 }
 0x2cc   : > { %4544 = vmatpush3.msra.mxu1 %v4514_v60 }
 0x2cd   : > { %4545 = vmatprep.subr.mxu1 %v1303_v61 }
 0x2ce   : > { %4546 = vmatpush3.msra.mxu1 %v1303_v61 }
 0x2cf   : > { %4547 = vmatprep.subr.mxu1 %v4511_v58 }
 0x2d0   : > { %4548 = vmatpush3.msra.mxu1 %v4511_v58 }
 0x2d1   : > { %4549 = vmatprep.subr.mxu1 %v1293_v59 }
 0x2d2   : > { %4550 = vmatpush3.msra.mxu1 %v1293_v59 }
 0x2d3   : > { %4551 = vmatprep.subr.mxu1 %v4508_v56 }
 0x2d4   : > { %4552 = vmatpush3.msra.mxu1 %v4508_v56 }
 0x2d5   : > { %4553 = vmatprep.subr.mxu1 %v1283_v57 }
 0x2d6   : > { %4554 = vmatpush3.msra.mxu1 %v1283_v57 }
 0x2d7   : > { %4555 = vmatprep.subr.mxu1 %v4505_v54 }
 0x2d8   : > { %4556 = vmatpush3.msra.mxu1 %v4505_v54 }
 0x2d9   : > { %4557 = vmatprep.subr.mxu1 %v1273_v55 }
 0x2da   : > { %4558 = vmatpush3.msra.mxu1 %v1273_v55 }
 0x2db   : > { %4560 = vmatmul.mubr.f32.vlgmr.msra.gmra.mxu1 %v5218_v35 }
 0x2dc   : > { %4562 = vmatprep.mubr.f32.mxu1 %v5221_v36 }
 0x2df   : > { %4563 = vmatmul.mubr.f32.gmra.mxu1 %v5226_v37 }
 0x2e0   : > { %4565 = vmatprep.mubr.f32.mxu1 %v5229_v38 }
 0x2e3   : > { %4566 = vmatmul.mubr.f32.gmra.mxu1 %v5234_v39 }
 0x2e4   : > { %4568 = vmatprep.mubr.f32.mxu1 %v5237_v40 }
 0x2e7   : > { %4569 = vmatmul.mubr.f32.gmra.mxu1 %v5242_v41 }
 0x2e8   : > { %4571 = vmatprep.mubr.f32.mxu1 %v5245_v42 }
 0x2eb   : > { %4572 = vmatmul.mubr.f32.gmra.mxu1 %v5250_v43 }
 0x2ec   : > { %4574 = vmatprep.mubr.f32.mxu1 %v5253_v44 }
 0x2ef   : > { %4575 = vmatmul.mubr.f32.gmra.mxu1 %v5258_v45 }
 0x2f0   : > { %4577 = vmatprep.mubr.f32.mxu1 %v5261_v46 }
 0x2f3   : > { %4578 = vmatmul.mubr.f32.gmra.mxu1 %v5266_v47 }
 0x2f4   : > { %4580 = vmatprep.mubr.f32.mxu1 %v5269_v48 }
 0x2f7   : > { %4581 = vmatmul.mubr.f32.gmra.mxu1 %v5274_v49 }
 0x2f8   : > { %4643 = vmatprep.mubr.f32.mxu1 %v5214_v18 }
 0x39b   : > { %v4561_v8 = vpop.f32.mrf.mxu1 }
 0x39c   : > { %v1430_v9 = vadd.f32 %v4561_v8, %v3923_v7 }
 0x39d   : > { %v1424_v10 = vpop.f32.mrf.mxu1 }
 0x39e   : > { %v1425_v18 = vadd.f32 %v3923_v7, %v1424_v10  ;;  %v1504_v13 = vmax.f32 %v1430_v9, 0.0 }
 0x39f   : > { %v4564_v11 = vpop.f32.mrf.mxu1 }
 0x3a0   : > { %v1503_v12 = vmax.f32 %v1425_v18, 0.0  ;;  %v1440_v14 = vadd.f32 %v4564_v11, %v3923_v7 }
 0x3a1   : > { %v1434_v15 = vpop.f32.mrf.mxu1 }
 0x3a2   : > { %v1435_v16 = vadd.f32 %v3923_v7, %v1434_v15  ;;  %4587 = vmatprep.mubr.msk.f32.mxu0 %vm1158_vm2, %v1503_v12  ;;  %v1506_v20 = vmax.f32 %v1440_v14, 0.0 }
 0x3a3   : > { %v4567_v17 = vpop.f32.mrf.mxu1  ;;  %4588 = vmatmul.mubr.msk.f32.vlgmr.msra.gmra.mxu0 %vm1158_vm2, %v1504_v13 }
 0x3a4   : > { %v1505_v19 = vmax.f32 %v1435_v16, 0.0  ;;  %v1450_v21 = vadd.f32 %v4567_v17, %v3923_v7 }
 0x3a5   : > { %v1444_v22 = vpop.f32.mrf.mxu1 }
 0x3a6   : > { %v1445_v23 = vadd.f32 %v3923_v7, %v1444_v22  ;;  %4590 = vmatprep.mubr.msk.f32.mxu0 %vm1158_vm2, %v1505_v19  ;;  %v1508_v26 = vmax.f32 %v1450_v21, 0.0 }
 0x3a7   : > { %v4570_v24 = vpop.f32.mrf.mxu1  ;;  %4591 = vmatmul.mubr.msk.f32.gmra.mxu0 %vm1158_vm2, %v1506_v20 }
 0x3a8   : > { %v1507_v25 = vmax.f32 %v1445_v23, 0.0  ;;  %v1460_v27 = vadd.f32 %v4570_v24, %v3923_v7 }
 0x3a9   : > { %v1454_v28 = vpop.f32.mrf.mxu1 }
 0x3aa   : > { %v1455_v29 = vadd.f32 %v3923_v7, %v1454_v28  ;;  %4593 = vmatprep.mubr.msk.f32.mxu0 %vm1158_vm2, %v1507_v25  ;;  %v1510_v32 = vmax.f32 %v1460_v27, 0.0 }
 0x3ab   : > { %v4573_v30 = vpop.f32.mrf.mxu1  ;;  %4594 = vmatmul.mubr.msk.f32.gmra.mxu0 %vm1158_vm2, %v1508_v26 }
 0x3ac   : > { %v1509_v31 = vmax.f32 %v1455_v29, 0.0  ;;  %v1470_v33 = vadd.f32 %v4573_v30, %v3923_v7 }
 0x3ad   : > { %v1464_v34 = vpop.f32.mrf.mxu1 }
 0x3ae   : > { %v1465_v50 = vadd.f32 %v3923_v7, %v1464_v34  ;;  %4596 = vmatprep.mubr.msk.f32.mxu0 %vm1158_vm2, %v1509_v31  ;;  %v1512_v54 = vmax.f32 %v1470_v33, 0.0 }
 0x3af   : > { %v4576_v51 = vpop.f32.mrf.mxu1  ;;  %4597 = vmatmul.mubr.msk.f32.gmra.mxu0 %vm1158_vm2, %v1510_v32 }
 0x3b0   : > { %v1511_v53 = vmax.f32 %v1465_v50, 0.0  ;;  %v1480_v55 = vadd.f32 %v4576_v51, %v3923_v7 }
 0x3b1   : > { %v1474_v56 = vpop.f32.mrf.mxu1 }
 0x3b2   : > { %v1475_v57 = vadd.f32 %v3923_v7, %v1474_v56  ;;  %4599 = vmatprep.mubr.msk.f32.mxu0 %vm1158_vm2, %v1511_v53  ;;  %v1514_v60 = vmax.f32 %v1480_v55, 0.0 }
 0x3b3   : > { %v4579_v58 = vpop.f32.mrf.mxu1  ;;  %4600 = vmatmul.mubr.msk.f32.gmra.mxu0 %vm1158_vm2, %v1512_v54 }
 0x3b4   : > { %v1513_v59 = vmax.f32 %v1475_v57, 0.0  ;;  %v1490_v61 = vadd.f32 %v4579_v58, %v3923_v7 }
 0x3b5   : > { %v1484_v62 = vpop.f32.mrf.mxu1 }
 0x3b6   : > { %v1485_v52 = vadd.f32 %v3923_v7, %v1484_v62  ;;  %4602 = vmatprep.mubr.msk.f32.mxu0 %vm1158_vm2, %v1513_v59  ;;  %v1516_v1 = vmax.f32 %v1490_v61, 0.0  ;;  %v2236_v61 = vld [vmem:[%s6064_s12 + $0x78] sm:$0xff]  ;;  %v2251_v62 = vld [vmem:[%s6064_s12 + $0xf0] sm:$0xff] }
 0x3b7   : > { %v4582_v63 = vpop.f32.mrf.mxu1  ;;  %4603 = vmatmul.mubr.msk.f32.gmra.mxu0 %vm1158_vm2, %v1514_v60  ;;  %v2252_v60 = vld [vmem:[%s6064_s12 + $0xf8] sm:$0xff] }
 0x3b8   : > { %v1515_v0 = vmax.f32 %v1485_v52, 0.0  ;;  %v1500_v2 = vadd.f32 %v4582_v63, %v3923_v7  ;;  %v2235_v52 = vld [vmem:[%s6064_s12 + $0x70] sm:$0xff]  ;;  %v2250_v63 = vld [vmem:[%s6064_s12 + $0xe8] sm:$0xff] }
 0x3b9   : > { %v1494_v3 = vpop.f32.mrf.mxu1 }
 0x3ba   : > { %v1495_v4 = vadd.f32 %v3923_v7, %v1494_v3  ;;  %4605 = vmatprep.mubr.msk.f32.mxu0 %vm1158_vm2, %v1515_v0  ;;  %v1518_v6 = vmax.f32 %v1500_v2, 0.0  ;;  %v2234_v0 = vld [vmem:[%s6064_s12 + $0x68] sm:$0xff]  ;;  %v2233_v2 = vld [vmem:[%s6064_s12 + $0x60] sm:$0xff]  ;;  %v2248_v3 = vld [vmem:[%s6064_s12 + $0xd8] sm:$0xff] }
 0x3bb   : > { %4606 = vmatmul.mubr.msk.f32.gmra.mxu0 %vm1158_vm2, %v1516_v1  ;;  %v2249_v1 = vld [vmem:[%s6064_s12 + $0xe0] sm:$0xff] }
 0x3bc   : > { %v1517_v5 = vmax.f32 %v1495_v4, 0.0  ;;  %v2232_v4 = vld [vmem:[%s6064_s12 + $0x58] sm:$0xff] }
 0x3be   : > { %4608 = vmatprep.mubr.msk.f32.mxu0 %vm1158_vm2, %v1517_v5  ;;  %v2247_v5 = vld [vmem:[%s6064_s12 + $0xd0] sm:$0xff] }
 0x3bf   : > { %4609 = vmatmul.mubr.msk.f32.gmra.mxu0 %vm1158_vm2, %v1518_v6  ;;  %v2231_v6 = vld [vmem:[%s6064_s12 + $0x50] sm:$0xff] }
 0x463   : > { %v4589_v8 = vpop.f32.mrf.mxu0 }
 0x465   : > { %v1636_v9 = vpop.f32.mrf.mxu0 }
 0x467   : > { %v4592_v10 = vpop.f32.mrf.mxu0 }
 0x469   : > { %v1646_v18 = vpop.f32.mrf.mxu0 }
 0x46b   : > { %v4595_v11 = vpop.f32.mrf.mxu0 }
 0x46d   : > { %v1656_v12 = vpop.f32.mrf.mxu0 }
 0x46f   : > { %v4598_v13 = vpop.f32.mrf.mxu0 }
 0x471   : > { %v1666_v14 = vpop.f32.mrf.mxu0 }
 0x473   : > { %v4601_v15 = vpop.f32.mrf.mxu0 }
 0x475   : > { %v1676_v7 = vpop.f32.mrf.mxu0 }
 0x477   : > { %v4604_v16 = vpop.f32.mrf.mxu0 }
 0x479   : > { %v1686_v17 = vpop.f32.mrf.mxu0 }
 0x47b   : > { %v4607_v19 = vpop.f32.mrf.mxu0 }
 0x47d   : > { %v1696_v20 = vpop.f32.mrf.mxu0 }
 0x47f   : > { %v4610_v21 = vpop.f32.mrf.mxu0 }
 0x480   : > { %4611 = vmatprep.subr.mxu1 %v4610_v21 }
 0x481   : > { %v1706_v22 = vpop.f32.mrf.mxu0  ;;  %4612 = vmatpush3.msra.mxu1 %v4610_v21  ;;  %v2239_v21 = vld [vmem:[%s6064_s12 + $0x90] sm:$0xff] }
 0x482   : > { %4613 = vmatprep.subr.mxu1 %v1706_v22 }
 0x483   : > { %4614 = vmatpush3.msra.mxu1 %v1706_v22  ;;  %v2223_v22 = vld [vmem:[%s6064_s12 + $0x10] sm:$0xff] }
 0x484   : > { %4615 = vmatprep.subr.mxu1 %v4607_v19 }
 0x485   : > { %4616 = vmatpush3.msra.mxu1 %v4607_v19  ;;  %v2240_v19 = vld [vmem:[%s6064_s12 + $0x98] sm:$0xff] }
 0x486   : > { %4617 = vmatprep.subr.mxu1 %v1696_v20 }
 0x487   : > { %4618 = vmatpush3.msra.mxu1 %v1696_v20  ;;  %v2224_v20 = vld [vmem:[%s6064_s12 + $0x18] sm:$0xff] }
 0x488   : > { %4619 = vmatprep.subr.mxu1 %v4604_v16 }
 0x489   : > { %4620 = vmatpush3.msra.mxu1 %v4604_v16  ;;  %v2241_v16 = vld [vmem:[%s6064_s12 + $0xa0] sm:$0xff] }
 0x48a   : > { %4621 = vmatprep.subr.mxu1 %v1686_v17 }
 0x48b   : > { %4622 = vmatpush3.msra.mxu1 %v1686_v17  ;;  %v2225_v17 = vld [vmem:[%s6064_s12 + $0x20] sm:$0xff] }
 0x48c   : > { %4623 = vmatprep.subr.mxu1 %v4601_v15 }
 0x48d   : > { %4624 = vmatpush3.msra.mxu1 %v4601_v15  ;;  %v2242_v15 = vld [vmem:[%s6064_s12 + $0xa8] sm:$0xff] }
 0x48e   : > { %4625 = vmatprep.subr.mxu1 %v1676_v7 }
 0x48f   : > { %4626 = vmatpush3.msra.mxu1 %v1676_v7  ;;  %v2226_v7 = vld [vmem:[%s6064_s12 + $0x28] sm:$0xff] }
 0x490   : > { %4627 = vmatprep.subr.mxu1 %v4598_v13 }
 0x491   : > { %4628 = vmatpush3.msra.mxu1 %v4598_v13  ;;  %v2243_v13 = vld [vmem:[%s6064_s12 + $0xb0] sm:$0xff] }
 0x492   : > { %4629 = vmatprep.subr.mxu1 %v1666_v14 }
 0x493   : > { %4630 = vmatpush3.msra.mxu1 %v1666_v14  ;;  %v2227_v14 = vld [vmem:[%s6064_s12 + $0x30] sm:$0xff] }
 0x494   : > { %4631 = vmatprep.subr.mxu1 %v4595_v11 }
 0x495   : > { %4632 = vmatpush3.msra.mxu1 %v4595_v11  ;;  %v2244_v11 = vld [vmem:[%s6064_s12 + $0xb8] sm:$0xff] }
 0x496   : > { %4633 = vmatprep.subr.mxu1 %v1656_v12 }
 0x497   : > { %4634 = vmatpush3.msra.mxu1 %v1656_v12  ;;  %v2228_v12 = vld [vmem:[%s6064_s12 + $0x38] sm:$0xff] }
 0x498   : > { %4635 = vmatprep.subr.mxu1 %v4592_v10 }
 0x499   : > { %4636 = vmatpush3.msra.mxu1 %v4592_v10  ;;  %v2245_v10 = vld [vmem:[%s6064_s12 + $0xc0] sm:$0xff] }
 0x49a   : > { %4637 = vmatprep.subr.mxu1 %v1646_v18 }
 0x49b   : > { %4638 = vmatpush3.msra.mxu1 %v1646_v18  ;;  %v2229_v18 = vld [vmem:[%s6064_s12 + $0x40] sm:$0xff] }
 0x49c   : > { %4639 = vmatprep.subr.mxu1 %v4589_v8 }
 0x49d   : > { %4640 = vmatpush3.msra.mxu1 %v4589_v8  ;;  %v2246_v8 = vld [vmem:[%s6064_s12 + $0xc8] sm:$0xff] }
 0x49e   : > { %4641 = vmatprep.subr.mxu1 %v1636_v9 }
 0x49f   : > { %4642 = vmatpush3.msra.mxu1 %v1636_v9  ;;  %v2230_v9 = vld [vmem:[%s6064_s12 + $0x48] sm:$0xff] }
 0x4a0   : > { %4644 = vmatmul.mubr.f32.vlgmr.msra.gmra.mxu1 %v5218_v35  ;;  %v1867_v35 = vld [vmem:[%s6096_s0 + $0x8] sm:$0xff]  ;;  %4198 = vmatprep.subr.mxu1 %v2252_v60  ;;  %v2106_v60 = vld [vmem:[%s6062_s10 + $0xe0] sm:$0xff] }
 0x4a1   : > { %4646 = vmatprep.mubr.f32.mxu1 %v5221_v36  ;;  %1947 = vmatprep.subr.mxu0 %v1867_v35  ;;  %v1866_v36 = vld [vmem:[%s6096_s0] sm:$0xff] }
 0x4a2   : > { %1948 = vmatpush1.msra.mxu0 %v1866_v36  ;;  %4199 = vmatpush3.msra.mxu1 %v2236_v61 }
 0x4a3   : > { %4200 = vmatprep.subr.mxu1 %v2251_v62  ;;  %v2105_v62 = vld [vmem:[%s6062_s10 + $0xd8] sm:$0xff] }
 0x4a4   : > { %4647 = vmatmul.mubr.f32.gmra.mxu1 %v5226_v37  ;;  %v5022_v37 = vmov 0.0  }
 0x4a5   : > { %4649 = vmatprep.mubr.f32.mxu1 %v5229_v38  ;;  %1981 = vmatprep.mubr.f32.mxu0 %v5022_v37 }
 0x4a6   : > { %4201 = vmatpush3.msra.mxu1 %v2235_v52 }
 0x4a7   : > { %4202 = vmatprep.subr.mxu1 %v2250_v63  ;;  %v2104_v63 = vld [vmem:[%s6062_s10 + $0xd0] sm:$0xff] }
 0x4a8   : > { %4650 = vmatmul.mubr.f32.gmra.mxu1 %v5234_v39  ;;  %v3940_v39 = vld [vmem:[%s6097_s4] ss:$0 sm:$0xff] }
 0x4a9   : > { %4652 = vmatprep.mubr.f32.mxu1 %v5237_v40  ;;  %4203 = vmatpush3.msra.mxu1 %v2234_v0 }
 0x4aa   : > { %4204 = vmatprep.subr.mxu1 %v2249_v1  ;;  %v2103_v1 = vld [vmem:[%s6062_s10 + $0xc8] sm:$0xff] }
 0x4ab   : > { %4205 = vmatpush3.msra.mxu1 %v2233_v2 }
 0x4ac   : > { %4653 = vmatmul.mubr.f32.gmra.mxu1 %v5242_v41  ;;  %4206 = vmatprep.subr.mxu1 %v2248_v3  ;;  %v2102_v3 = vld [vmem:[%s6062_s10 + $0xc0] sm:$0xff] }
 0x4ad   : > { %4655 = vmatprep.mubr.f32.mxu1 %v5245_v42  ;;  %4207 = vmatpush3.msra.mxu1 %v2232_v4 }
 0x4ae   : > { %4208 = vmatprep.subr.mxu1 %v2247_v5  ;;  %v2101_v5 = vld [vmem:[%s6062_s10 + $0xb8] sm:$0xff] }
 0x4af   : > { %4209 = vmatpush3.msra.mxu1 %v2231_v6 }
 0x4b0   : > { %4656 = vmatmul.mubr.f32.gmra.mxu1 %v5250_v43  ;;  %4210 = vmatprep.subr.mxu1 %v2246_v8  ;;  %v2100_v8 = vld [vmem:[%s6062_s10 + $0xb0] sm:$0xff] }
 0x4b1   : > { %4658 = vmatprep.mubr.f32.mxu1 %v5253_v44  ;;  %4211 = vmatpush3.msra.mxu1 %v2230_v9 }
 0x4b2   : > { %4212 = vmatprep.subr.mxu1 %v2245_v10  ;;  %v2099_v10 = vld [vmem:[%s6062_s10 + $0xa8] sm:$0xff] }
 0x4b3   : > { %4213 = vmatpush3.msra.mxu1 %v2229_v18 }
 0x4b4   : > { %4659 = vmatmul.mubr.f32.gmra.mxu1 %v5258_v45  ;;  %4214 = vmatprep.subr.mxu1 %v2244_v11  ;;  %v2098_v11 = vld [vmem:[%s6062_s10 + $0xa0] sm:$0xff] }
 0x4b5   : > { %4661 = vmatprep.mubr.f32.mxu1 %v5261_v46  ;;  %4215 = vmatpush3.msra.mxu1 %v2228_v12 }
 0x4b6   : > { %4216 = vmatprep.subr.mxu1 %v2243_v13  ;;  %v2097_v13 = vld [vmem:[%s6062_s10 + $0x98] sm:$0xff] }
 0x4b7   : > { %4217 = vmatpush3.msra.mxu1 %v2227_v14 }
 0x4b8   : > { %4662 = vmatmul.mubr.f32.gmra.mxu1 %v5266_v47  ;;  %4218 = vmatprep.subr.mxu1 %v2242_v15  ;;  %v2096_v15 = vld [vmem:[%s6062_s10 + $0x90] sm:$0xff] }
 0x4b9   : > { %4664 = vmatprep.mubr.f32.mxu1 %v5269_v48  ;;  %4219 = vmatpush3.msra.mxu1 %v2226_v7 }
 0x4ba   : > { %4220 = vmatprep.subr.mxu1 %v2241_v16  ;;  %v2095_v16 = vld [vmem:[%s6062_s10 + $0x88] sm:$0xff] }
 0x4bb   : > { %4221 = vmatpush3.msra.mxu1 %v2225_v17 }
 0x4bc   : > { %4665 = vmatmul.mubr.f32.gmra.mxu1 %v5274_v49  ;;  %4222 = vmatprep.subr.mxu1 %v2240_v19  ;;  %v2094_v19 = vld [vmem:[%s6062_s10 + $0x80] sm:$0xff] }
 0x4bd   : > { %4223 = vmatpush3.msra.mxu1 %v2224_v20 }
 0x4be   : > { %4224 = vmatprep.subr.mxu1 %v2239_v21  ;;  %v2093_v21 = vld [vmem:[%s6062_s10 + $0x78] sm:$0xff] }
 0x4bf   : > { %4225 = vmatpush3.msra.mxu1 %v2223_v22 }
 0x560   : > { %v4645_v38 = vpop.f32.mrf.mxu1 }
 0x561   : > { %v1793_v43 = vadd.f32 %v4645_v38, %v3940_v39 }
 0x562   : > { %v1787_v40 = vpop.f32.mrf.mxu1 }
 0x563   : > { %v1788_v41 = vadd.f32 %v3940_v39, %v1787_v40 }
 0x564   : > { %v4648_v42 = vpop.f32.mrf.mxu1 }
 0x565   : > { %3941 = vmatmul.mubr.msk.f32.vlgmr.msra.gmra.mxu0 %vm1868_vm3, %v1788_v41  ;;  %v1803_v47 = vadd.f32 %v4648_v42, %v3940_v39 }
 0x566   : > { %1987 = vmatprep.mubr.f32.mxu0 %v5022_v37  ;;  %v1797_v44 = vpop.f32.mrf.mxu1 }
 0x567   : > { %v1798_v45 = vadd.f32 %v3940_v39, %v1797_v44 }
 0x568   : > { %v4651_v46 = vpop.f32.mrf.mxu1 }
 0x569   : > { %3942 = vmatmul.mubr.msk.f32.gmra.mxu0 %vm1868_vm3, %v1793_v43  ;;  %v1813_v24 = vadd.f32 %v4651_v46, %v3940_v39 }
 0x56a   : > { %1993 = vmatprep.mubr.f32.mxu0 %v5022_v37  ;;  %v1807_v48 = vpop.f32.mrf.mxu1 }
 0x56b   : > { %v1808_v49 = vadd.f32 %v3940_v39, %v1807_v48 }
 0x56c   : > { %v4654_v23 = vpop.f32.mrf.mxu1 }
 0x56d   : > { %3943 = vmatmul.mubr.msk.f32.gmra.mxu0 %vm1868_vm3, %v1798_v45  ;;  %v1823_v28 = vadd.f32 %v4654_v23, %v3940_v39 }
 0x56e   : > { %1999 = vmatprep.mubr.f32.mxu0 %v5022_v37  ;;  %v1817_v25 = vpop.f32.mrf.mxu1 }
 0x56f   : > { %v1818_v26 = vadd.f32 %v3940_v39, %v1817_v25 }
 0x570   : > { %v4657_v27 = vpop.f32.mrf.mxu1 }
 0x571   : > { %3944 = vmatmul.mubr.msk.f32.gmra.mxu0 %vm1868_vm3, %v1803_v47  ;;  %v1833_v32 = vadd.f32 %v4657_v27, %v3940_v39 }
 0x572   : > { %2005 = vmatprep.mubr.f32.mxu0 %v5022_v37  ;;  %v1827_v29 = vpop.f32.mrf.mxu1 }
 0x573   : > { %v1828_v30 = vadd.f32 %v3940_v39, %v1827_v29 }
 0x574   : > { %v4660_v31 = vpop.f32.mrf.mxu1 }
 0x575   : > { %3945 = vmatmul.mubr.msk.f32.gmra.mxu0 %vm1868_vm3, %v1808_v49  ;;  %v1843_v51 = vadd.f32 %v4660_v31, %v3940_v39 }
 0x576   : > { %2011 = vmatprep.mubr.f32.mxu0 %v5022_v37  ;;  %v1837_v33 = vpop.f32.mrf.mxu1 }
 0x577   : > { %v1838_v34 = vadd.f32 %v3940_v39, %v1837_v33 }
 0x578   : > { %v4663_v50 = vpop.f32.mrf.mxu1 }
 0x579   : > { %3946 = vmatmul.mubr.msk.f32.gmra.mxu0 %vm1868_vm3, %v1813_v24  ;;  %v1853_v56 = vadd.f32 %v4663_v50, %v3940_v39 }
 0x57a   : > { %2017 = vmatprep.mubr.f32.mxu0 %v5022_v37  ;;  %v1847_v53 = vpop.f32.mrf.mxu1 }
 0x57b   : > { %v1848_v54 = vadd.f32 %v3940_v39, %v1847_v53 }
 0x57c   : > { %v4666_v55 = vpop.f32.mrf.mxu1 }
 0x57d   : > { %3947 = vmatmul.mubr.msk.f32.gmra.mxu0 %vm1868_vm3, %v1818_v26  ;;  %v1863_v59 = vadd.f32 %v4666_v55, %v3940_v39 }
 0x57e   : > { %2023 = vmatprep.mubr.f32.mxu0 %v5022_v37  ;;  %v1857_v57 = vpop.f32.mrf.mxu1 }
 0x57f   : > { %v1858_v58 = vadd.f32 %v3940_v39, %v1857_v57  ;;  %v2108_v57 = vld [vmem:[%s6062_s10 + $0xf0] sm:$0xff] }
 0x581   : > { %3948 = vmatmul.mubr.msk.f32.gmra.mxu0 %vm1868_vm3, %v1823_v28 }
 0x582   : > { %2029 = vmatprep.mubr.f32.mxu0 %v5022_v37 }
 0x585   : > { %3949 = vmatmul.mubr.msk.f32.gmra.mxu0 %vm1868_vm3, %v1828_v30 }
 0x586   : > { %2035 = vmatprep.mubr.f32.mxu0 %v5022_v37 }
 0x589   : > { %3950 = vmatmul.mubr.msk.f32.gmra.mxu0 %vm1868_vm3, %v1833_v32 }
 0x58a   : > { %2041 = vmatprep.mubr.f32.mxu0 %v5022_v37 }
 0x58d   : > { %3951 = vmatmul.mubr.msk.f32.gmra.mxu0 %vm1868_vm3, %v1838_v34 }
 0x58e   : > { %2047 = vmatprep.mubr.f32.mxu0 %v5022_v37 }
 0x591   : > { %3952 = vmatmul.mubr.msk.f32.gmra.mxu0 %vm1868_vm3, %v1843_v51 }
 0x592   : > { %2053 = vmatprep.mubr.f32.mxu0 %v5022_v37 }
 0x595   : > { %3953 = vmatmul.mubr.msk.f32.gmra.mxu0 %vm1868_vm3, %v1848_v54 }
 0x596   : > { %2059 = vmatprep.mubr.f32.mxu0 %v5022_v37 }
 0x599   : > { %3954 = vmatmul.mubr.msk.f32.gmra.mxu0 %vm1868_vm3, %v1853_v56  ;;  %v2109_v56 = vld [vmem:[%s6062_s10 + $0xf8] sm:$0xff] }
 0x59a   : > { %2065 = vmatprep.mubr.f32.mxu0 %v5022_v37 }
 0x59d   : > { %3955 = vmatmul.mubr.msk.f32.gmra.mxu0 %vm1868_vm3, %v1858_v58  ;;  %v2107_v58 = vld [vmem:[%s6062_s10 + $0xe8] sm:$0xff] }
 0x59e   : > { %2071 = vmatprep.mubr.f32.mxu0 %v5022_v37 }
 0x5a1   : > { %3956 = vmatmul.mubr.msk.f32.gmra.mxu0 %vm1868_vm3, %v1863_v59 }
 0x5a2   : > { %2208 = vmatprep.mubr.f32.mxu0 %v5022_v37 }
 0x625   : > { %v5485_v35 = vpop.f32.mrf.mxu0 }
 0x627   : > { %v5487_v36 = vpop.f32.mrf.mxu0 }
 0x629   : > { %v5489_v38 = vpop.f32.mrf.mxu0 }
 0x62b   : > { %v5491_v39 = vpop.f32.mrf.mxu0 }
 0x62d   : > { %v5493_v40 = vpop.f32.mrf.mxu0 }
 0x62f   : > { %v5495_v41 = vpop.f32.mrf.mxu0 }
 0x631   : > { %v5497_v42 = vpop.f32.mrf.mxu0 }
 0x633   : > { %v5499_v43 = vpop.f32.mrf.mxu0 }
 0x635   : > { %v5501_v44 = vpop.f32.mrf.mxu0 }
 0x637   : > { %v5503_v45 = vpop.f32.mrf.mxu0 }
 0x639   : > { %v5505_v46 = vpop.f32.mrf.mxu0 }
 0x63b   : > { %v5507_v47 = vpop.f32.mrf.mxu0 }
 0x63d   : > { %v5509_v48 = vpop.f32.mrf.mxu0 }
 0x63f   : > { %v5511_v49 = vpop.f32.mrf.mxu0 }
 0x641   : > { %v5513_v23 = vpop.f32.mrf.mxu0 }
 0x643   : > { %v5515_v24 = vpop.f32.mrf.mxu0 }
 0x645   : > { %v5517_v25 = vpop.f32.mrf.mxu0 }
 0x647   : > { %v2033_v26 = vpop.f32.mrf.mxu0 }
 0x649   : > { %v2037_v27 = vpop.f32.mrf.mxu0 }
 0x64a   : > { %v2128_v22 = vmul.f32 %v2096_v15, %v2037_v27  ;;  %v2125_v27 = vmul.f32 %v2093_v21, %v5515_v24 }
 0x64b   : > { %v2039_v28 = vpop.f32.mrf.mxu0 }
 0x64c   : > { %v2129_v20 = vmul.f32 %v2097_v13, %v2039_v28  ;;  %v2090_v28 = vld [vmem:[%s6062_s10 + $0x60] sm:$0xff] }
 0x64d   : > { %v2043_v29 = vpop.f32.mrf.mxu0  ;;  %v2122_v24 = vmul.f32 %v2090_v28, %v5509_v48  ;;  %v2340_v28 = vld [vmem:[%s6067_s15 + $0x28] sm:$0xff] }
 0x64e   : > { %v2130_v17 = vmul.f32 %v2098_v11, %v2043_v29  ;;  %v2091_v29 = vld [vmem:[%s6062_s10 + $0x68] sm:$0xff] }
 0x64f   : > { %v2045_v30 = vpop.f32.mrf.mxu0 }
 0x650   : > { %v2131_v7 = vmul.f32 %v2099_v10, %v2045_v30  ;;  %v2092_v30 = vld [vmem:[%s6062_s10 + $0x70] sm:$0xff] }
 0x651   : > { %v2049_v31 = vpop.f32.mrf.mxu0 }
 0x652   : > { %v2132_v14 = vmul.f32 %v2100_v8, %v2049_v31  ;;  %v2127_v31 = vmul.f32 %v2095_v16, %v2033_v26  ;;  %v2124_v26 = vmul.f32 %v2092_v30, %v5513_v23  ;;  %v2676_v16 = vld [vmem:[%s6069_s17 + $0x38] sm:$0xff]  ;;  %v2336_v30 = vld [vmem:[%s6067_s15 + $0x8] sm:$0xff] }
 0x653   : > { %v2051_v32 = vpop.f32.mrf.mxu0 }
 0x654   : > { %v2133_v12 = vmul.f32 %v2101_v5, %v2051_v32  ;;  %v2126_v32 = vmul.f32 %v2094_v19, %v5517_v25  ;;  %v2123_v25 = vmul.f32 %v2091_v29, %v5511_v49  ;;  %v2352_v5 = vld [vmem:[%s6065_s13 + $0x8] sm:$0xff]  ;;  %v2338_v29 = vld [vmem:[%s6067_s15 + $0x18] sm:$0xff] }
 0x655   : > { %v2055_v33 = vpop.f32.mrf.mxu0  ;;  %v2674_v19 = vld [vmem:[%s6069_s17 + $0x28] sm:$0xff] }
 0x656   : > { %v2134_v18 = vmul.f32 %v2102_v3, %v2055_v33  ;;  %v2089_v33 = vld [vmem:[%s6062_s10 + $0x58] sm:$0xff] }
 0x657   : > { %v2057_v34 = vpop.f32.mrf.mxu0  ;;  %v2121_v23 = vmul.f32 %v2089_v33, %v5507_v47  ;;  %v2354_v3 = vld [vmem:[%s6065_s13 + $0x18] sm:$0xff] }
 0x658   : > { %v2135_v9 = vmul.f32 %v2103_v1, %v2057_v34  ;;  %v2088_v34 = vld [vmem:[%s6062_s10 + $0x50] sm:$0xff]  ;;  %v2342_v33 = vld [vmem:[%s6067_s15 + $0x38] sm:$0xff] }
 0x659   : > { %v2061_v50 = vpop.f32.mrf.mxu0  ;;  %v2120_v49 = vmul.f32 %v2088_v34, %v5505_v46  ;;  %v2344_v34 = vld [vmem:[%s6067_s15 + $0x48] sm:$0xff] }
 0x65a   : > { %v2136_v6 = vmul.f32 %v2104_v63, %v2061_v50  ;;  %v2087_v50 = vld [vmem:[%s6062_s10 + $0x48] sm:$0xff] }
 0x65b   : > { %v2063_v51 = vpop.f32.mrf.mxu0  ;;  %v2119_v48 = vmul.f32 %v2087_v50, %v5503_v45  ;;  %v2346_v50 = vld [vmem:[%s6067_s15 + $0x58] sm:$0xff] }
 0x65c   : > { %v2137_v4 = vmul.f32 %v2105_v62, %v2063_v51  ;;  %v2086_v51 = vld [vmem:[%s6062_s10 + $0x40] sm:$0xff] }
 0x65d   : > { %v2067_v53 = vpop.f32.mrf.mxu0  ;;  %v2118_v47 = vmul.f32 %v2086_v51, %v5501_v44  ;;  %v2348_v51 = vld [vmem:[%s6067_s15 + $0x68] sm:$0xff] }
 0x65e   : > { %v2138_v2 = vmul.f32 %v2106_v60, %v2067_v53  ;;  %v2085_v53 = vld [vmem:[%s6062_s10 + $0x38] sm:$0xff]  ;;  %v2078_v60 = vld [vmem:[%s6062_s10] sm:$0xff] }
 0x65f   : > { %v2069_v54 = vpop.f32.mrf.mxu0  ;;  %v2117_v46 = vmul.f32 %v2085_v53, %v5499_v43  ;;  %v2110_v62 = vmul.f32 %v2078_v60, %v5485_v35  ;;  %v2222_v35 = vld [vmem:[%s6064_s12 + $0x8] sm:$0xff]  ;;  %v2350_v53 = vld [vmem:[%s6067_s15 + $0x78] sm:$0xff] }
 0x660   : > { %v2139_v0 = vmul.f32 %v2107_v58, %v2069_v54  ;;  %v2084_v54 = vld [vmem:[%s6062_s10 + $0x30] sm:$0xff] }
 0x661   : > { %v2073_v55 = vpop.f32.mrf.mxu0  ;;  %v2116_v45 = vmul.f32 %v2084_v54, %v5497_v42  ;;  %v2080_v58 = vld [vmem:[%s6062_s10 + $0x10] sm:$0xff] }
 0x662   : > { %v2140_v52 = vmul.f32 %v2108_v57, %v2073_v55  ;;  %v2083_v55 = vld [vmem:[%s6062_s10 + $0x28] sm:$0xff]  ;;  %v2081_v57 = vld [vmem:[%s6062_s10 + $0x18] sm:$0xff]  ;;  %v2671_v54 = vld [vmem:[%s6069_s17 + $0x10] sm:$0xff] }
 0x663   : > { %v2075_v59 = vpop.f32.mrf.mxu0  ;;  %v2115_v44 = vmul.f32 %v2083_v55, %v5495_v41  ;;  %v2113_v42 = vmul.f32 %v2081_v57, %v5491_v39  ;;  %v2237_v39 = vld [vmem:[%s6064_s12 + $0x80] sm:$0xff] }
 0x664   : > { %v2141_v61 = vmul.f32 %v2109_v56, %v2075_v59  ;;  %v2082_v56 = vld [vmem:[%s6062_s10 + $0x20] sm:$0xff]  ;;  %v2079_v59 = vld [vmem:[%s6062_s10 + $0x8] sm:$0xff] }
 0x665   : > { %v2114_v43 = vmul.f32 %v2082_v56, %v5493_v40  ;;  %v2111_v41 = vmul.f32 %v2079_v59, %v5487_v36  ;;  %v2142_v40 = vld [vmem:[%s6063_s11] sm:$0xff]  ;;  %v2238_v36 = vld [vmem:[%s6064_s12 + $0x88] sm:$0xff] }
 0x666   : > { %2144 = vmatprep.subr.mxu0 %v2141_v61  ;;  %v2112_v61 = vmul.f32 %v2080_v58, %v5489_v38  ;;  %v2143_v38 = vld [vmem:[%s6063_s11 + $0x8] sm:$0xff]  ;;  %4226 = vmatprep.subr.mxu1 %v2238_v36  ;;  %v2669_v55 = vld [vmem:[%s6069_s17] sm:$0xff] }
 0x667   : > { %2145 = vmatpush1.msra.mxu0 %v2140_v52  ;;  %4227 = vmatpush3.msra.mxu1 %v2222_v35  ;;  %v2221_v52 = vld [vmem:[%s6064_s12] sm:$0xff]  ;;  %v2638_v58 = vld [vmem:[%s6068_s16 + $0x8] sm:$0xff] }
 0x668   : > { %2146 = vmatprep.subr.mxu0 %v2139_v0  ;;  %4228 = vmatprep.subr.mxu1 %v2237_v39 }
 0x669   : > { %2147 = vmatpush1.msra.mxu0 %v2138_v2  ;;  %4229 = vmatpush3.msra.mxu1 %v2221_v52 }
 0x66a   : > { %2148 = vmatprep.subr.mxu0 %v2137_v4  ;;  %v2353_v4 = vld [vmem:[%s6065_s13 + $0x10] sm:$0xff]  ;;  %4706 = vmatprep.subr.mxu1 %v2676_v16 }
 0x66b   : > { %2149 = vmatpush1.msra.mxu0 %v2136_v6  ;;  %v2351_v6 = vld [vmem:[%s6065_s13] sm:$0xff] }
 0x66c   : > { %2150 = vmatprep.subr.mxu0 %v2135_v9  ;;  %v3957_v9 = vld [vmem:[%s6061_s9] ss:$0 sm:$0xff] }
 0x66d   : > { %2151 = vmatpush1.msra.mxu0 %v2134_v18 }
 0x66e   : > { %2152 = vmatprep.subr.mxu0 %v2133_v12 }
 0x66f   : > { %2153 = vmatpush1.msra.mxu0 %v2132_v14 }
 0x670   : > { %2154 = vmatprep.subr.mxu0 %v2131_v7  ;;  %v2335_v7 = vld [vmem:[%s6067_s15] sm:$0xff] }
 0x671   : > { %2155 = vmatpush1.msra.mxu0 %v2130_v17  ;;  %v2675_v17 = vld [vmem:[%s6069_s17 + $0x30] sm:$0xff] }
 0x672   : > { %2156 = vmatprep.subr.mxu0 %v2129_v20  ;;  %v2673_v20 = vld [vmem:[%s6069_s17 + $0x20] sm:$0xff] }
 0x673   : > { %2157 = vmatpush1.msra.mxu0 %v2128_v22 }
 0x674   : > { %2158 = vmatprep.subr.mxu0 %v2127_v31  ;;  %v2337_v31 = vld [vmem:[%s6067_s15 + $0x10] sm:$0xff] }
 0x675   : > { %2159 = vmatpush1.msra.mxu0 %v2126_v32  ;;  %v2339_v32 = vld [vmem:[%s6067_s15 + $0x20] sm:$0xff] }
 0x676   : > { %2160 = vmatprep.subr.mxu0 %v2125_v27  ;;  %v2341_v27 = vld [vmem:[%s6067_s15 + $0x30] sm:$0xff] }
 0x677   : > { %2161 = vmatpush1.msra.mxu0 %v2124_v26  ;;  %v2343_v26 = vld [vmem:[%s6067_s15 + $0x40] sm:$0xff] }
 0x678   : > { %2162 = vmatprep.subr.mxu0 %v2123_v25  ;;  %v2345_v25 = vld [vmem:[%s6067_s15 + $0x50] sm:$0xff] }
 0x679   : > { %2163 = vmatpush1.msra.mxu0 %v2122_v24  ;;  %v2347_v24 = vld [vmem:[%s6067_s15 + $0x60] sm:$0xff] }
 0x67a   : > { %2164 = vmatprep.subr.mxu0 %v2121_v23  ;;  %v2349_v23 = vld [vmem:[%s6067_s15 + $0x70] sm:$0xff] }
 0x67b   : > { %2165 = vmatpush1.msra.mxu0 %v2120_v49  ;;  %v2672_v49 = vld [vmem:[%s6069_s17 + $0x18] sm:$0xff] }
 0x67c   : > { %2166 = vmatprep.subr.mxu0 %v2119_v48  ;;  %v2670_v48 = vld [vmem:[%s6069_s17 + $0x8] sm:$0xff] }
 0x67d   : > { %2167 = vmatpush1.msra.mxu0 %v2118_v47  ;;  %v5757_v47 = vld [vmem:[%s6066_s14] ss:$0 sm:$0xff] }
 0x67e   : > { %2168 = vmatprep.subr.mxu0 %v2117_v46 }
 0x67f   : > { %2169 = vmatpush1.msra.mxu0 %v2116_v45  ;;  %v2637_v45 = vld [vmem:[%s6068_s16] sm:$0xff] }
 0x680   : > { %2170 = vmatprep.subr.mxu0 %v2115_v44 }
 0x681   : > { %2171 = vmatpush1.msra.mxu0 %v2114_v43 }
 0x682   : > { %2172 = vmatprep.subr.mxu0 %v2113_v42 }
 0x683   : > { %2173 = vmatpush1.msra.mxu0 %v2112_v61 }
 0x684   : > { %2174 = vmatprep.subr.mxu0 %v2111_v41  ;;  %v2639_v41 = vld [vmem:[%s6068_s16 + $0x10] sm:$0xff] }
 0x685   : > { %2175 = vmatpush1.msra.mxu0 %v2110_v62  ;;  %v2640_v62 = vld [vmem:[%s6068_s16 + $0x18] sm:$0xff] }
 0x686   : > { %2209 = vmatmul.mubr.f32.vlgmr.msra.gmra.mxu0 %v2142_v40  ;;  %4667 = vmatprep.subr.mxu0 %v2354_v3 }
 0x687   : > { %2214 = vmatprep.mubr.f32.mxu0 %v5022_v37  ;;  %4668 = vmatpush3.msra.mxu0 %v2354_v3 }
 0x688   : > { %4669 = vmatprep.subr.mxu0 %v2353_v4 }
 0x689   : > { %4670 = vmatpush3.msra.mxu0 %v2353_v4 }
 0x68a   : > { %2215 = vmatmul.mubr.f32.gmra.mxu0 %v2143_v38  ;;  %4671 = vmatprep.subr.mxu0 %v2352_v5 }
 0x68b   : > { %4672 = vmatpush3.msra.mxu0 %v2352_v5 }
 0x68c   : > { %4673 = vmatprep.subr.mxu0 %v2351_v6 }
 0x68d   : > { %4674 = vmatpush3.msra.mxu0 %v2351_v6 }
 0x746   : > { %v2210_v63 = vpop.f32.mrf.mxu0 }
 0x748   : > { %v2212_v0 = vpop.f32.mrf.mxu0 }
 0x749   : > { %2324 = vmatprep.mubr.f32.mxu1 %v2212_v0  ;;  %v2642_v0 = vld [vmem:[%s6068_s16 + $0x28] sm:$0xff] }
 0x74a   : > { %v2216_v1 = vpop.f32.mrf.mxu0  ;;  %2325 = vmatmul.mubr.f32.vlgmr.msra.gmra.mxu1 %v2210_v63  ;;  %v2641_v63 = vld [vmem:[%s6068_s16 + $0x20] sm:$0xff] }
 0x74b   : > { %4707 = vmatpush3.msra.mxu1 %v2676_v16 }
 0x74c   : > { %v2218_v2 = vpop.f32.mrf.mxu0  ;;  %4708 = vmatprep.subr.mxu1 %v2675_v17 }
 0x74d   : > { %2329 = vmatprep.mubr.f32.mxu1 %v2218_v2  ;;  %4709 = vmatpush3.msra.mxu1 %v2675_v17 }
 0x74e   : > { %2330 = vmatmul.mubr.f32.gmra.mxu1 %v2216_v1  ;;  %4710 = vmatprep.subr.mxu1 %v2674_v19 }
 0x74f   : > { %4711 = vmatpush3.msra.mxu1 %v2674_v19 }
 0x750   : > { %4712 = vmatprep.subr.mxu1 %v2673_v20 }
 0x751   : > { %4713 = vmatpush3.msra.mxu1 %v2673_v20 }
 0x752   : > { %4714 = vmatprep.subr.mxu1 %v2672_v49 }
 0x753   : > { %4715 = vmatpush3.msra.mxu1 %v2672_v49 }
 0x754   : > { %4716 = vmatprep.subr.mxu1 %v2671_v54 }
 0x755   : > { %4717 = vmatpush3.msra.mxu1 %v2671_v54  ;;  %v2651_v54 = vld [vmem:[%s6068_s16 + $0x70] sm:$0xff] }
 0x756   : > { %4718 = vmatprep.subr.mxu1 %v2670_v48 }
 0x757   : > { %4719 = vmatpush3.msra.mxu1 %v2670_v48  ;;  %v2652_v48 = vld [vmem:[%s6068_s16 + $0x78] sm:$0xff] }
 0x758   : > { %4720 = vmatprep.subr.mxu1 %v2669_v55 }
 0x759   : > { %4721 = vmatpush3.msra.mxu1 %v2669_v55 }
 0x80a   : > { %v4230_v8 = vpop.f32.mrf.mxu1 }
 0x80c   : > { %v4231_v10 = vpop.f32.mrf.mxu1 }
 0x80d   : > { %v4232_v18 = vadd.f32 %v4231_v10, %v4230_v8  ;;  %v2643_v8 = vld [vmem:[%s6068_s16 + $0x30] sm:$0xff] }
 0x80e   : > { %v4233_v11 = vpop.f32.mrf.mxu1 }
 0x80f   : > { %v2327_v12 = vadd.f32 %v4232_v18, %v3957_v9 }
 0x810   : > { %v4234_v13 = vpop.f32.mrf.mxu1 }
 0x811   : > { %v4235_v14 = vadd.f32 %v4234_v13, %v4233_v11  ;;  %4675 = vmatprep.mubr.msk.f32.mxu0 %vm2355_vm4, %v2327_v12 }
 0x813   : > { %v2332_v15 = vadd.f32 %v4235_v14, %v3957_v9  ;;  %v2644_v9 = vld [vmem:[%s6068_s16 + $0x38] sm:$0xff] }
 0x815   : > { %4676 = vmatmul.mubr.msk.f32.vlgmr.msra.gmra.mxu0 %vm2355_vm4, %v2332_v15  ;;  %v2645_v15 = vld [vmem:[%s6068_s16 + $0x40] sm:$0xff] }
 0x816   : > { %4682 = vmatprep.mubr.msk.f32.mxu0 %vm1158_vm2, %v2335_v7  ;;  %v2646_v7 = vld [vmem:[%s6068_s16 + $0x48] sm:$0xff] }
 0x8d5   : > { %v4677_v21 = vpop.f32.mrf.mxu0 }
 0x8d6   : > { %4678 = vmatprep.subr.mxu0 %v4677_v21 }
 0x8d7   : > { %v2428_v22 = vpop.f32.mrf.mxu0  ;;  %4679 = vmatpush3.msra.mxu0 %v4677_v21 }
 0x8d8   : > { %4680 = vmatprep.subr.mxu0 %v2428_v22 }
 0x8d9   : > { %4681 = vmatpush3.msra.mxu0 %v2428_v22 }
 0x8da   : > { %4683 = vmatmul.mubr.msk.f32.vlgmr.msra.gmra.mxu0 %vm1158_vm2, %v2336_v30  ;;  %v2647_v30 = vld [vmem:[%s6068_s16 + $0x50] sm:$0xff] }
 0x8db   : > { %4685 = vmatprep.mubr.msk.f32.mxu0 %vm1158_vm2, %v2337_v31  ;;  %v2648_v31 = vld [vmem:[%s6068_s16 + $0x58] sm:$0xff] }
 0x8de   : > { %4686 = vmatmul.mubr.msk.f32.gmra.mxu0 %vm1158_vm2, %v2338_v29 }
 0x8df   : > { %4688 = vmatprep.mubr.msk.f32.mxu0 %vm1158_vm2, %v2339_v32 }
 0x8e2   : > { %4689 = vmatmul.mubr.msk.f32.gmra.mxu0 %vm1158_vm2, %v2340_v28 }
 0x8e3   : > { %4691 = vmatprep.mubr.msk.f32.mxu0 %vm1158_vm2, %v2341_v27 }
 0x8e6   : > { %4692 = vmatmul.mubr.msk.f32.gmra.mxu0 %vm1158_vm2, %v2342_v33 }
 0x8e7   : > { %4694 = vmatprep.mubr.msk.f32.mxu0 %vm1158_vm2, %v2343_v26 }
 0x8ea   : > { %4695 = vmatmul.mubr.msk.f32.gmra.mxu0 %vm1158_vm2, %v2344_v34  ;;  %v2649_v34 = vld [vmem:[%s6068_s16 + $0x60] sm:$0xff] }
 0x8eb   : > { %4697 = vmatprep.mubr.msk.f32.mxu0 %vm1158_vm2, %v2345_v25  ;;  %v2650_v25 = vld [vmem:[%s6068_s16 + $0x68] sm:$0xff] }
 0x8ee   : > { %4698 = vmatmul.mubr.msk.f32.gmra.mxu0 %vm1158_vm2, %v2346_v50 }
 0x8ef   : > { %4700 = vmatprep.mubr.msk.f32.mxu0 %vm1158_vm2, %v2347_v24 }
 0x8f2   : > { %4701 = vmatmul.mubr.msk.f32.gmra.mxu0 %vm1158_vm2, %v2348_v51 }
 0x8f3   : > { %4703 = vmatprep.mubr.msk.f32.mxu0 %vm1158_vm2, %v2349_v23 }
 0x8f6   : > { %4704 = vmatmul.mubr.msk.f32.gmra.mxu0 %vm1158_vm2, %v2350_v53 }
 0x99a   : > { %v4684_v56 = vpop.f32.mrf.mxu0 }
 0x99b   : > { %v2564_v46 = vadd.f32 %v4684_v56, %v5757_v47 }
 0x99c   : > { %v2558_v57 = vpop.f32.mrf.mxu0 }
 0x99d   : > { %v2559_v44 = vadd.f32 %v5757_v47, %v2558_v57  ;;  %v2654_v60 = vmul.f32 %v2638_v58, %v2564_v46  ;;  %v5840_v57 = vld [vmem:[%s5211_s1] sm:$0xff] }
 0x99e   : > { %v4687_v59 = vpop.f32.mrf.mxu0 }
 0x99f   : > { %v2653_v43 = vmul.f32 %v2637_v45, %v2559_v44  ;;  %v2574_v42 = vadd.f32 %v4687_v59, %v5757_v47  ;;  %v2887_v45 = vld [vmem:[%s6070_s18] sm:$0xff] }
 0x9a0   : > { %v2568_v61 = vpop.f32.mrf.mxu0  ;;  %4746 = vmatprep.subr.mxu0 %v2887_v45 }
 0x9a1   : > { %v2569_v40 = vadd.f32 %v5757_v47, %v2568_v61  ;;  %4722 = vmatprep.mubr.msk.f32.mxu1 %vm2677_vm5, %v2653_v43  ;;  %v2656_v35 = vmul.f32 %v2640_v62, %v2574_v42  ;;  %4747 = vmatpush3.msra.mxu0 %v2887_v45  ;;  %v5915_v45 = vld [vmem:[%s5211_s1 + $0x70] sm:$0xff] }
 0x9a2   : > { %v4690_v38 = vpop.f32.mrf.mxu0  ;;  %4723 = vmatmul.mubr.msk.f32.vlgmr.msra.gmra.mxu1 %vm2677_vm5, %v2654_v60 }
 0x9a3   : > { %v2655_v36 = vmul.f32 %v2639_v41, %v2569_v40  ;;  %v2584_v39 = vadd.f32 %v4690_v38, %v5757_v47 }
 0x9a4   : > { %v2578_v52 = vpop.f32.mrf.mxu0 }
 0x9a5   : > { %v2579_v1 = vadd.f32 %v5757_v47, %v2578_v52  ;;  %4725 = vmatprep.mubr.msk.f32.mxu1 %vm2677_vm5, %v2655_v36  ;;  %v2658_v4 = vmul.f32 %v2642_v0, %v2584_v39 }
 0x9a6   : > { %v4693_v2 = vpop.f32.mrf.mxu0  ;;  %4726 = vmatmul.mubr.msk.f32.gmra.mxu1 %vm2677_vm5, %v2656_v35 }
 0x9a7   : > { %v2657_v3 = vmul.f32 %v2641_v63, %v2579_v1  ;;  %v2594_v5 = vadd.f32 %v4693_v2, %v5757_v47 }
 0x9a8   : > { %v2588_v6 = vpop.f32.mrf.mxu0 }
 0x9a9   : > { %v2589_v10 = vadd.f32 %v5757_v47, %v2588_v6  ;;  %4728 = vmatprep.mubr.msk.f32.mxu1 %vm2677_vm5, %v2657_v3  ;;  %v2660_v12 = vmul.f32 %v2644_v9, %v2594_v5 }
 0x9aa   : > { %v4696_v18 = vpop.f32.mrf.mxu0  ;;  %4729 = vmatmul.mubr.msk.f32.gmra.mxu1 %vm2677_vm5, %v2658_v4 }
 0x9ab   : > { %v2659_v11 = vmul.f32 %v2643_v8, %v2589_v10  ;;  %v2604_v13 = vadd.f32 %v4696_v18, %v5757_v47 }
 0x9ac   : > { %v2598_v14 = vpop.f32.mrf.mxu0 }
 0x9ad   : > { %v2599_v16 = vadd.f32 %v5757_v47, %v2598_v14  ;;  %4731 = vmatprep.mubr.msk.f32.mxu1 %vm2677_vm5, %v2659_v11  ;;  %v2662_v20 = vmul.f32 %v2646_v7, %v2604_v13 }
 0x9ae   : > { %v4699_v17 = vpop.f32.mrf.mxu0  ;;  %4732 = vmatmul.mubr.msk.f32.gmra.mxu1 %vm2677_vm5, %v2660_v12 }
 0x9af   : > { %v2661_v19 = vmul.f32 %v2645_v15, %v2599_v16  ;;  %v2614_v21 = vadd.f32 %v4699_v17, %v5757_v47 }
 0x9b0   : > { %v2608_v22 = vpop.f32.mrf.mxu0 }
 0x9b1   : > { %v2609_v29 = vadd.f32 %v5757_v47, %v2608_v22  ;;  %4734 = vmatprep.mubr.msk.f32.mxu1 %vm2677_vm5, %v2661_v19  ;;  %v2664_v27 = vmul.f32 %v2648_v31, %v2614_v21 }
 0x9b2   : > { %v4702_v32 = vpop.f32.mrf.mxu0  ;;  %4735 = vmatmul.mubr.msk.f32.gmra.mxu1 %vm2677_vm5, %v2662_v20 }
 0x9b3   : > { %v2663_v28 = vmul.f32 %v2647_v30, %v2609_v29  ;;  %v2624_v33 = vadd.f32 %v4702_v32, %v5757_v47 }
 0x9b4   : > { %v2618_v26 = vpop.f32.mrf.mxu0 }
 0x9b5   : > { %v2619_v50 = vadd.f32 %v5757_v47, %v2618_v26  ;;  %4737 = vmatprep.mubr.msk.f32.mxu1 %vm2677_vm5, %v2663_v28  ;;  %v2666_v23 = vmul.f32 %v2650_v25, %v2624_v33  ;;  %v5867_v25 = vld [vmem:[%s5211_s1 + $0x10] sm:$0xff] }
 0x9b6   : > { %v4705_v24 = vpop.f32.mrf.mxu0  ;;  %4738 = vmatmul.mubr.msk.f32.gmra.mxu1 %vm2677_vm5, %v2664_v27 }
 0x9b7   : > { %v2665_v51 = vmul.f32 %v2649_v34, %v2619_v50  ;;  %v2634_v53 = vadd.f32 %v4705_v24, %v5757_v47  ;;  %v5863_v34 = vld [vmem:[%s5211_s1 + $0x8] sm:$0xff]  ;;  %v5871_v50 = vld [vmem:[%s5211_s1 + $0x18] sm:$0xff]  ;;  %v5875_v24 = vld [vmem:[%s5211_s1 + $0x20] sm:$0xff] }
 0x9b8   : > { %v2628_v49 = vpop.f32.mrf.mxu0 }
 0x9b9   : > { %v2629_v55 = vadd.f32 %v5757_v47, %v2628_v49  ;;  %4740 = vmatprep.mubr.msk.f32.mxu1 %vm2677_vm5, %v2665_v51  ;;  %v2668_v46 = vmul.f32 %v2652_v48, %v2634_v53  ;;  %v5879_v51 = vld [vmem:[%s5211_s1 + $0x28] sm:$0xff]  ;;  %v5887_v53 = vld [vmem:[%s5211_s1 + $0x38] sm:$0xff]  ;;  %v5891_v49 = vld [vmem:[%s5211_s1 + $0x40] sm:$0xff] }
 0x9ba   : > { %4741 = vmatmul.mubr.msk.f32.gmra.mxu1 %vm2677_vm5, %v2666_v23  ;;  %v5883_v23 = vld [vmem:[%s5211_s1 + $0x30] sm:$0xff] }
 0x9bb   : > { %v2667_v56 = vmul.f32 %v2651_v54, %v2629_v55  ;;  %v5895_v54 = vld [vmem:[%s5211_s1 + $0x48] sm:$0xff]  ;;  %v5899_v48 = vld [vmem:[%s5211_s1 + $0x50] sm:$0xff]  ;;  %v5903_v55 = vld [vmem:[%s5211_s1 + $0x58] sm:$0xff] }
 0x9bd   : > { %4743 = vmatprep.mubr.msk.f32.mxu1 %vm2677_vm5, %v2667_v56  ;;  %v5907_v56 = vld [vmem:[%s5211_s1 + $0x60] sm:$0xff] }
 0x9be   : > { %4744 = vmatmul.mubr.msk.f32.gmra.mxu1 %vm2677_vm5, %v2668_v46  ;;  %v5911_v46 = vld [vmem:[%s5211_s1 + $0x68] sm:$0xff] }
 0x9bf   : > { %4804 = vmatprep.mubr.f32.mxu1 %v5840_v57 }
 0xa62   : > { %v4724_v47 = vpop.f32.mrf.mxu1 }
 0xa63   : > { %v2872_v59 = vmax.f32 %v4724_v47, 0.0  ;;  %v5919_v47 = vld [vmem:[%s5211_s1 + $0x78] sm:$0xff] }
 0xa64   : > { %v2792_v58 = vpop.f32.mrf.mxu1 }
 0xa65   : > { %v2871_v44 = vmax.f32 %v2792_v58, 0.0  ;;  %v3250_v58 = vld [vmem:[%s6072_s20 + $0x8] sm:$0xff] }
 0xa66   : > { %v4727_v43 = vpop.f32.mrf.mxu1  ;;  %4828 = vmatprep.subr.mxu0 %v3250_v58 }
 0xa67   : > { %4748 = vmatprep.mubr.msk.f32.mxu0 %vm1868_vm3, %v2871_v44  ;;  %v2874_v61 = vmax.f32 %v4727_v43, 0.0  ;;  %v3249_v44 = vld [vmem:[%s6072_s20] sm:$0xff] }
 0xa68   : > { %v2802_v60 = vpop.f32.mrf.mxu1  ;;  %4749 = vmatmul.mubr.msk.f32.vlgmr.msra.gmra.mxu0 %vm1868_vm3, %v2872_v59  ;;  %v4009_v59 = vld [vmem:[%s6071_s19] ss:$0 sm:$0xff] }
 0xa69   : > { %v2873_v42 = vmax.f32 %v2802_v60, 0.0  ;;  %4829 = vmatpush3.msra.mxu0 %v3250_v58 }
 0xa6a   : > { %v4730_v41 = vpop.f32.mrf.mxu1  ;;  %4830 = vmatprep.subr.mxu0 %v3249_v44 }
 0xa6b   : > { %4751 = vmatprep.mubr.msk.f32.mxu0 %vm1868_vm3, %v2873_v42  ;;  %v2876_v38 = vmax.f32 %v4730_v41, 0.0  ;;  %4831 = vmatpush3.msra.mxu0 %v3249_v44 }
 0xa6c   : > { %v2812_v62 = vpop.f32.mrf.mxu1  ;;  %4752 = vmatmul.mubr.msk.f32.gmra.mxu0 %vm1868_vm3, %v2874_v61  ;;  %4912 = vmatprep.subr.mxu0 %v5022_v37 }
 0xa6d   : > { %v2875_v40 = vmax.f32 %v2812_v62, 0.0 }
 0xa6e   : > { %v4733_v36 = vpop.f32.mrf.mxu1 }
 0xa6f   : > { %4754 = vmatprep.mubr.msk.f32.mxu0 %vm1868_vm3, %v2875_v40  ;;  %v2878_v52 = vmax.f32 %v4733_v36, 0.0 }
 0xa70   : > { %v2822_v35 = vpop.f32.mrf.mxu1  ;;  %4755 = vmatmul.mubr.msk.f32.gmra.mxu0 %vm1868_vm3, %v2876_v38 }
 0xa71   : > { %v2877_v39 = vmax.f32 %v2822_v35, 0.0 }
 0xa72   : > { %v4736_v63 = vpop.f32.mrf.mxu1 }
 0xa73   : > { %4757 = vmatprep.mubr.msk.f32.mxu0 %vm1868_vm3, %v2877_v39  ;;  %v2880_v2 = vmax.f32 %v4736_v63, 0.0 }
 0xa74   : > { %v2832_v0 = vpop.f32.mrf.mxu1  ;;  %4758 = vmatmul.mubr.msk.f32.gmra.mxu0 %vm1868_vm3, %v2878_v52 }
 0xa75   : > { %v2879_v1 = vmax.f32 %v2832_v0, 0.0 }
 0xa76   : > { %v4739_v3 = vpop.f32.mrf.mxu1 }
 0xa77   : > { %4760 = vmatprep.mubr.msk.f32.mxu0 %vm1868_vm3, %v2879_v1  ;;  %v2882_v6 = vmax.f32 %v4739_v3, 0.0 }
 0xa78   : > { %v2842_v4 = vpop.f32.mrf.mxu1  ;;  %4761 = vmatmul.mubr.msk.f32.gmra.mxu0 %vm1868_vm3, %v2880_v2 }
 0xa79   : > { %v2881_v5 = vmax.f32 %v2842_v4, 0.0 }
 0xa7a   : > { %v4742_v8 = vpop.f32.mrf.mxu1 }
 0xa7b   : > { %4763 = vmatprep.mubr.msk.f32.mxu0 %vm1868_vm3, %v2881_v5  ;;  %v2884_v18 = vmax.f32 %v4742_v8, 0.0 }
 0xa7c   : > { %v2852_v9 = vpop.f32.mrf.mxu1  ;;  %4764 = vmatmul.mubr.msk.f32.gmra.mxu0 %vm1868_vm3, %v2882_v6 }
 0xa7d   : > { %v2883_v10 = vmax.f32 %v2852_v9, 0.0 }
 0xa7e   : > { %v4745_v11 = vpop.f32.mrf.mxu1 }
 0xa7f   : > { %4766 = vmatprep.mubr.msk.f32.mxu0 %vm1868_vm3, %v2883_v10  ;;  %v2886_v14 = vmax.f32 %v4745_v11, 0.0 }
 0xa80   : > { %v2862_v12 = vpop.f32.mrf.mxu1  ;;  %4767 = vmatmul.mubr.msk.f32.gmra.mxu0 %vm1868_vm3, %v2884_v18 }
 0xa81   : > { %v2885_v13 = vmax.f32 %v2862_v12, 0.0 }
 0xa83   : > { %4769 = vmatprep.mubr.msk.f32.mxu0 %vm1868_vm3, %v2885_v13 }
 0xa84   : > { %4770 = vmatmul.mubr.msk.f32.gmra.mxu0 %vm1868_vm3, %v2886_v14 }
 0xb28   : > { %v4750_v15 = vpop.f32.mrf.mxu0 }
 0xb2a   : > { %v3003_v7 = vpop.f32.mrf.mxu0 }
 0xb2c   : > { %v4753_v16 = vpop.f32.mrf.mxu0 }
 0xb2e   : > { %v3013_v17 = vpop.f32.mrf.mxu0 }
 0xb30   : > { %v4756_v19 = vpop.f32.mrf.mxu0 }
 0xb32   : > { %v3023_v20 = vpop.f32.mrf.mxu0 }
 0xb34   : > { %v4759_v21 = vpop.f32.mrf.mxu0 }
 0xb36   : > { %v3033_v22 = vpop.f32.mrf.mxu0 }
 0xb38   : > { %v4762_v30 = vpop.f32.mrf.mxu0 }
 0xb3a   : > { %v3043_v31 = vpop.f32.mrf.mxu0 }
 0xb3c   : > { %v4765_v29 = vpop.f32.mrf.mxu0 }
 0xb3e   : > { %v3053_v32 = vpop.f32.mrf.mxu0 }
 0xb40   : > { %v4768_v28 = vpop.f32.mrf.mxu0 }
 0xb42   : > { %v3063_v27 = vpop.f32.mrf.mxu0 }
 0xb44   : > { %v4771_v33 = vpop.f32.mrf.mxu0 }
 0xb45   : > { %4772 = vmatprep.subr.mxu1 %v4771_v33 }
 0xb46   : > { %v3073_v26 = vpop.f32.mrf.mxu0  ;;  %4773 = vmatpush3.msra.mxu1 %v4771_v33 }
 0xb47   : > { %4774 = vmatprep.subr.mxu1 %v3073_v26 }
 0xb48   : > { %4775 = vmatpush3.msra.mxu1 %v3073_v26 }
 0xb49   : > { %4776 = vmatprep.subr.mxu1 %v4768_v28 }
 0xb4a   : > { %4777 = vmatpush3.msra.mxu1 %v4768_v28 }
 0xb4b   : > { %4778 = vmatprep.subr.mxu1 %v3063_v27 }
 0xb4c   : > { %4779 = vmatpush3.msra.mxu1 %v3063_v27 }
 0xb4d   : > { %4780 = vmatprep.subr.mxu1 %v4765_v29 }
 0xb4e   : > { %4781 = vmatpush3.msra.mxu1 %v4765_v29 }
 0xb4f   : > { %4782 = vmatprep.subr.mxu1 %v3053_v32 }
 0xb50   : > { %4783 = vmatpush3.msra.mxu1 %v3053_v32 }
 0xb51   : > { %4784 = vmatprep.subr.mxu1 %v4762_v30 }
 0xb52   : > { %4785 = vmatpush3.msra.mxu1 %v4762_v30 }
 0xb53   : > { %4786 = vmatprep.subr.mxu1 %v3043_v31 }
 0xb54   : > { %4787 = vmatpush3.msra.mxu1 %v3043_v31 }
 0xb55   : > { %4788 = vmatprep.subr.mxu1 %v4759_v21 }
 0xb56   : > { %4789 = vmatpush3.msra.mxu1 %v4759_v21 }
 0xb57   : > { %4790 = vmatprep.subr.mxu1 %v3033_v22 }
 0xb58   : > { %4791 = vmatpush3.msra.mxu1 %v3033_v22 }
 0xb59   : > { %4792 = vmatprep.subr.mxu1 %v4756_v19 }
 0xb5a   : > { %4793 = vmatpush3.msra.mxu1 %v4756_v19 }
 0xb5b   : > { %4794 = vmatprep.subr.mxu1 %v3023_v20 }
 0xb5c   : > { %4795 = vmatpush3.msra.mxu1 %v3023_v20 }
 0xb5d   : > { %4796 = vmatprep.subr.mxu1 %v4753_v16 }
 0xb5e   : > { %4797 = vmatpush3.msra.mxu1 %v4753_v16 }
 0xb5f   : > { %4798 = vmatprep.subr.mxu1 %v3013_v17 }
 0xb60   : > { %4799 = vmatpush3.msra.mxu1 %v3013_v17 }
 0xb61   : > { %4800 = vmatprep.subr.mxu1 %v4750_v15 }
 0xb62   : > { %4801 = vmatpush3.msra.mxu1 %v4750_v15 }
 0xb63   : > { %4802 = vmatprep.subr.mxu1 %v3003_v7 }
 0xb64   : > { %4803 = vmatpush3.msra.mxu1 %v3003_v7 }
 0xb65   : > { %4805 = vmatmul.mubr.f32.vlgmr.msra.gmra.mxu1 %v5863_v34 }
 0xb66   : > { %4807 = vmatprep.mubr.f32.mxu1 %v5867_v25 }
 0xb69   : > { %4808 = vmatmul.mubr.f32.gmra.mxu1 %v5871_v50 }
 0xb6a   : > { %4810 = vmatprep.mubr.f32.mxu1 %v5875_v24 }
 0xb6d   : > { %4811 = vmatmul.mubr.f32.gmra.mxu1 %v5879_v51 }
 0xb6e   : > { %4813 = vmatprep.mubr.f32.mxu1 %v5883_v23 }
 0xb71   : > { %4814 = vmatmul.mubr.f32.gmra.mxu1 %v5887_v53 }
 0xb72   : > { %4816 = vmatprep.mubr.f32.mxu1 %v5891_v49 }
 0xb75   : > { %4817 = vmatmul.mubr.f32.gmra.mxu1 %v5895_v54 }
 0xb76   : > { %4819 = vmatprep.mubr.f32.mxu1 %v5899_v48 }
 0xb79   : > { %4820 = vmatmul.mubr.f32.gmra.mxu1 %v5903_v55 }
 0xb7a   : > { %4822 = vmatprep.mubr.f32.mxu1 %v5907_v56 }
 0xb7d   : > { %4823 = vmatmul.mubr.f32.gmra.mxu1 %v5911_v46 }
 0xb7e   : > { %4825 = vmatprep.mubr.f32.mxu1 %v5915_v45 }
 0xb81   : > { %4826 = vmatmul.mubr.f32.gmra.mxu1 %v5919_v47 }
 0xb82   : > { %4888 = vmatprep.mubr.f32.mxu1 %v5840_v57 }
 0xc25   : > { %v4806_v43 = vpop.f32.mrf.mxu1 }
 0xc26   : > { %v3160_v60 = vadd.f32 %v4806_v43, %v4009_v59 }
 0xc27   : > { %v3154_v42 = vpop.f32.mrf.mxu1 }
 0xc28   : > { %v3155_v61 = vadd.f32 %v4009_v59, %v3154_v42  ;;  %v3234_v40 = vmax.f32 %v3160_v60, 0.0 }
 0xc29   : > { %v4809_v41 = vpop.f32.mrf.mxu1 }
 0xc2a   : > { %v3233_v62 = vmax.f32 %v3155_v61, 0.0  ;;  %v3170_v38 = vadd.f32 %v4809_v41, %v4009_v59 }
 0xc2b   : > { %v3164_v36 = vpop.f32.mrf.mxu1 }
 0xc2c   : > { %v3165_v35 = vadd.f32 %v4009_v59, %v3164_v36  ;;  %4832 = vmatprep.mubr.msk.f32.mxu0 %vm1158_vm2, %v3233_v62  ;;  %v3236_v63 = vmax.f32 %v3170_v38, 0.0 }
 0xc2d   : > { %v4812_v39 = vpop.f32.mrf.mxu1  ;;  %4833 = vmatmul.mubr.msk.f32.vlgmr.msra.gmra.mxu0 %vm1158_vm2, %v3234_v40 }
 0xc2e   : > { %v3235_v52 = vmax.f32 %v3165_v35, 0.0  ;;  %v3180_v0 = vadd.f32 %v4812_v39, %v4009_v59 }
 0xc2f   : > { %v3174_v1 = vpop.f32.mrf.mxu1 }
 0xc30   : > { %v3175_v2 = vadd.f32 %v4009_v59, %v3174_v1  ;;  %4835 = vmatprep.mubr.msk.f32.mxu0 %vm1158_vm2, %v3235_v52  ;;  %v3238_v5 = vmax.f32 %v3180_v0, 0.0 }
 0xc31   : > { %v4815_v3 = vpop.f32.mrf.mxu1  ;;  %4836 = vmatmul.mubr.msk.f32.gmra.mxu0 %vm1158_vm2, %v3236_v63 }
 0xc32   : > { %v3237_v4 = vmax.f32 %v3175_v2, 0.0  ;;  %v3190_v6 = vadd.f32 %v4815_v3, %v4009_v59 }
 0xc33   : > { %v3184_v8 = vpop.f32.mrf.mxu1 }
 0xc34   : > { %v3185_v9 = vadd.f32 %v4009_v59, %v3184_v8  ;;  %4838 = vmatprep.mubr.msk.f32.mxu0 %vm1158_vm2, %v3237_v4  ;;  %v3240_v11 = vmax.f32 %v3190_v6, 0.0 }
 0xc35   : > { %v4818_v10 = vpop.f32.mrf.mxu1  ;;  %4839 = vmatmul.mubr.msk.f32.gmra.mxu0 %vm1158_vm2, %v3238_v5 }
 0xc36   : > { %v3239_v18 = vmax.f32 %v3185_v9, 0.0  ;;  %v3200_v12 = vadd.f32 %v4818_v10, %v4009_v59 }
 0xc37   : > { %v3194_v13 = vpop.f32.mrf.mxu1 }
 0xc38   : > { %v3195_v14 = vadd.f32 %v4009_v59, %v3194_v13  ;;  %4841 = vmatprep.mubr.msk.f32.mxu0 %vm1158_vm2, %v3239_v18  ;;  %v3242_v16 = vmax.f32 %v3200_v12, 0.0 }
 0xc39   : > { %v4821_v15 = vpop.f32.mrf.mxu1  ;;  %4842 = vmatmul.mubr.msk.f32.gmra.mxu0 %vm1158_vm2, %v3240_v11 }
 0xc3a   : > { %v3241_v7 = vmax.f32 %v3195_v14, 0.0  ;;  %v3210_v17 = vadd.f32 %v4821_v15, %v4009_v59 }
 0xc3b   : > { %v3204_v19 = vpop.f32.mrf.mxu1 }
 0xc3c   : > { %v3205_v20 = vadd.f32 %v4009_v59, %v3204_v19  ;;  %4844 = vmatprep.mubr.msk.f32.mxu0 %vm1158_vm2, %v3241_v7  ;;  %v3244_v30 = vmax.f32 %v3210_v17, 0.0 }
 0xc3d   : > { %v4824_v21 = vpop.f32.mrf.mxu1  ;;  %4845 = vmatmul.mubr.msk.f32.gmra.mxu0 %vm1158_vm2, %v3242_v16 }
 0xc3e   : > { %v3243_v22 = vmax.f32 %v3205_v20, 0.0  ;;  %v3220_v31 = vadd.f32 %v4824_v21, %v4009_v59 }
 0xc3f   : > { %v3214_v29 = vpop.f32.mrf.mxu1 }
 0xc40   : > { %v3215_v32 = vadd.f32 %v4009_v59, %v3214_v29  ;;  %4847 = vmatprep.mubr.msk.f32.mxu0 %vm1158_vm2, %v3243_v22  ;;  %v3246_v33 = vmax.f32 %v3220_v31, 0.0 }
 0xc41   : > { %v4827_v28 = vpop.f32.mrf.mxu1  ;;  %4848 = vmatmul.mubr.msk.f32.gmra.mxu0 %vm1158_vm2, %v3244_v30 }
 0xc42   : > { %v3245_v27 = vmax.f32 %v3215_v32, 0.0  ;;  %v3230_v26 = vadd.f32 %v4827_v28, %v4009_v59 }
 0xc43   : > { %v3224_v58 = vpop.f32.mrf.mxu1 }
 0xc44   : > { %v3225_v44 = vadd.f32 %v4009_v59, %v3224_v58  ;;  %4850 = vmatprep.mubr.msk.f32.mxu0 %vm1158_vm2, %v3245_v27  ;;  %v3248_v60 = vmax.f32 %v3230_v26, 0.0 }
 0xc45   : > { %4851 = vmatmul.mubr.msk.f32.gmra.mxu0 %vm1158_vm2, %v3246_v33 }
 0xc46   : > { %v3247_v43 = vmax.f32 %v3225_v44, 0.0 }
 0xc48   : > { %4853 = vmatprep.mubr.msk.f32.mxu0 %vm1158_vm2, %v3247_v43 }
 0xc49   : > { %4854 = vmatmul.mubr.msk.f32.gmra.mxu0 %vm1158_vm2, %v3248_v60 }
 0xc4a   : > { %4944 = vmatprep.mubr.msk.f32.mxu0 %vm5023_vm6, %v5022_v37 }
 0xced   : > { %v4834_v42 = vpop.f32.mrf.mxu0 }
 0xcef   : > { %v3366_v61 = vpop.f32.mrf.mxu0 }
 0xcf1   : > { %v4837_v41 = vpop.f32.mrf.mxu0 }
 0xcf3   : > { %v3376_v62 = vpop.f32.mrf.mxu0 }
 0xcf5   : > { %v4840_v40 = vpop.f32.mrf.mxu0 }
 0xcf7   : > { %v3386_v38 = vpop.f32.mrf.mxu0 }
 0xcf9   : > { %v4843_v36 = vpop.f32.mrf.mxu0 }
 0xcfb   : > { %v3396_v35 = vpop.f32.mrf.mxu0 }
 0xcfd   : > { %v4846_v39 = vpop.f32.mrf.mxu0 }
 0xcff   : > { %v3406_v59 = vpop.f32.mrf.mxu0 }
 0xd01   : > { %v4849_v52 = vpop.f32.mrf.mxu0 }
 0xd03   : > { %v3416_v63 = vpop.f32.mrf.mxu0 }
 0xd05   : > { %v4852_v0 = vpop.f32.mrf.mxu0 }
 0xd07   : > { %v3426_v1 = vpop.f32.mrf.mxu0 }
 0xd09   : > { %v4855_v2 = vpop.f32.mrf.mxu0 }
 0xd0a   : > { %4856 = vmatprep.subr.mxu1 %v4855_v2 }
 0xd0b   : > { %v3436_v3 = vpop.f32.mrf.mxu0  ;;  %4857 = vmatpush3.msra.mxu1 %v4855_v2 }
 0xd0c   : > { %4858 = vmatprep.subr.mxu1 %v3436_v3 }
 0xd0d   : > { %4859 = vmatpush3.msra.mxu1 %v3436_v3 }
 0xd0e   : > { %4860 = vmatprep.subr.mxu1 %v4852_v0 }
 0xd0f   : > { %4861 = vmatpush3.msra.mxu1 %v4852_v0 }
 0xd10   : > { %4862 = vmatprep.subr.mxu1 %v3426_v1 }
 0xd11   : > { %4863 = vmatpush3.msra.mxu1 %v3426_v1 }
 0xd12   : > { %4864 = vmatprep.subr.mxu1 %v4849_v52 }
 0xd13   : > { %4865 = vmatpush3.msra.mxu1 %v4849_v52 }
 0xd14   : > { %4866 = vmatprep.subr.mxu1 %v3416_v63 }
 0xd15   : > { %4867 = vmatpush3.msra.mxu1 %v3416_v63 }
 0xd16   : > { %4868 = vmatprep.subr.mxu1 %v4846_v39 }
 0xd17   : > { %4869 = vmatpush3.msra.mxu1 %v4846_v39 }
 0xd18   : > { %4870 = vmatprep.subr.mxu1 %v3406_v59 }
 0xd19   : > { %4871 = vmatpush3.msra.mxu1 %v3406_v59 }
 0xd1a   : > { %4872 = vmatprep.subr.mxu1 %v4843_v36 }
 0xd1b   : > { %4873 = vmatpush3.msra.mxu1 %v4843_v36 }
 0xd1c   : > { %4874 = vmatprep.subr.mxu1 %v3396_v35 }
 0xd1d   : > { %4875 = vmatpush3.msra.mxu1 %v3396_v35  ;;  %v3740_v35 = vlaneseq }
 0xd1e   : > { %4876 = vmatprep.subr.mxu1 %v4840_v40 }
 0xd1f   : > { %4877 = vmatpush3.msra.mxu1 %v4840_v40  ;;  %v5024_v40 = vmov 0   ;;  %v3741_v39 = vshrl.u32 %v3740_v35, 7 }
 0xd20   : > { %4878 = vmatprep.subr.mxu1 %v3386_v38  ;;  %4993 = vset.pattern.permute.xlu0 %v5024_v40 }
 0xd21   : > { %4879 = vmatpush3.msra.mxu1 %v3386_v38 }
 0xd22   : > { %4880 = vmatprep.subr.mxu1 %v4837_v41 }
 0xd23   : > { %4881 = vmatpush3.msra.mxu1 %v4837_v41  ;;  %v3612_v41 = vld [vmem:[%s6074_s22] sm:$0x1] }
 0xd24   : > { %4882 = vmatprep.subr.mxu1 %v3376_v62 }
 0xd25   : > { %4883 = vmatpush3.msra.mxu1 %v3376_v62  ;;  %v3734_v62 = vld [vmem:[#allocation2] sm:$0x1] }
 0xd26   : > { %4884 = vmatprep.subr.mxu1 %v4834_v42  ;;  %3737 = vperm.xlu0 %4993, %v3734_v62  }
 0xd27   : > { %4885 = vmatpush3.msra.mxu1 %v4834_v42 }
 0xd28   : > { %4886 = vmatprep.subr.mxu1 %v3366_v61 }
 0xd29   : > { %4887 = vmatpush3.msra.mxu1 %v3366_v61 }
 0xd2a   : > { %4889 = vmatmul.mubr.f32.vlgmr.msra.gmra.mxu1 %v5863_v34  ;;  %4947 = vmatprep.subr.mxu1 %v5022_v37 }
 0xd2b   : > { %4891 = vmatprep.mubr.f32.mxu1 %v5867_v25  ;;  %4948 = vmatpush3.xpose.msra.mxu1 %v5919_v47 }
 0xd2c   : > { %4949 = vmatprep.subr.mxu1 %v5022_v37 }
 0xd2e   : > { %4892 = vmatmul.mubr.f32.gmra.mxu1 %v5871_v50 }
 0xd2f   : > { %4894 = vmatprep.mubr.f32.mxu1 %v5875_v24  ;;  %4950 = vmatpush3.xpose.msra.mxu1 %v5915_v45 }
 0xd30   : > { %4951 = vmatprep.subr.mxu1 %v5022_v37 }
 0xd32   : > { %4895 = vmatmul.mubr.f32.gmra.mxu1 %v5879_v51 }
 0xd33   : > { %4897 = vmatprep.mubr.f32.mxu1 %v5883_v23  ;;  %4952 = vmatpush3.xpose.msra.mxu1 %v5911_v46 }
 0xd34   : > { %4953 = vmatprep.subr.mxu1 %v5022_v37 }
 0xd36   : > { %4898 = vmatmul.mubr.f32.gmra.mxu1 %v5887_v53 }
 0xd37   : > { %4900 = vmatprep.mubr.f32.mxu1 %v5891_v49  ;;  %4954 = vmatpush3.xpose.msra.mxu1 %v5907_v56 }
 0xd38   : > { %4955 = vmatprep.subr.mxu1 %v5022_v37 }
 0xd3a   : > { %4901 = vmatmul.mubr.f32.gmra.mxu1 %v5895_v54 }
 0xd3b   : > { %4903 = vmatprep.mubr.f32.mxu1 %v5899_v48  ;;  %4956 = vmatpush3.xpose.msra.mxu1 %v5903_v55 }
 0xd3c   : > { %4957 = vmatprep.subr.mxu1 %v5022_v37 }
 0xd3e   : > { %4904 = vmatmul.mubr.f32.gmra.mxu1 %v5903_v55 }
 0xd3f   : > { %4906 = vmatprep.mubr.f32.mxu1 %v5907_v56  ;;  %4958 = vmatpush3.xpose.msra.mxu1 %v5899_v48 }
 0xd40   : > { %4959 = vmatprep.subr.mxu1 %v5022_v37 }
 0xd42   : > { %4907 = vmatmul.mubr.f32.gmra.mxu1 %v5911_v46 }
 0xd43   : > { %4909 = vmatprep.mubr.f32.mxu1 %v5915_v45  ;;  %4960 = vmatpush3.xpose.msra.mxu1 %v5895_v54  ;;  %v4026_v45 = vld [vmem:[%s6073_s21] ss:$0 sm:$0xff] }
 0xd44   : > { %4961 = vmatprep.subr.mxu1 %v5022_v37 }
 0xd46   : > { %4910 = vmatmul.mubr.f32.gmra.mxu1 %v5919_v47 }
 0xd47   : > { %4962 = vmatpush3.xpose.msra.mxu1 %v5891_v49  ;;  %4979 = vmatprep.mubr.msk.f32.mxu1 %vm5023_vm6, %v5022_v37 }
 0xd48   : > { %4963 = vmatprep.subr.mxu1 %v5022_v37 }
 0xd4b   : > { %4964 = vmatpush3.xpose.msra.mxu1 %v5887_v53 }
 0xd4c   : > { %4965 = vmatprep.subr.mxu1 %v5022_v37 }
 0xd4f   : > { %4966 = vmatpush3.xpose.msra.mxu1 %v5883_v23 }
 0xd50   : > { %4967 = vmatprep.subr.mxu1 %v5022_v37 }
 0xd53   : > { %4968 = vmatpush3.xpose.msra.mxu1 %v5879_v51 }
 0xd54   : > { %4969 = vmatprep.subr.mxu1 %v5022_v37 }
 0xd57   : > { %4970 = vmatpush3.xpose.msra.mxu1 %v5875_v24 }
 0xd58   : > { %4971 = vmatprep.subr.mxu1 %v5022_v37 }
 0xd5b   : > { %4972 = vmatpush3.xpose.msra.mxu1 %v5871_v50 }
 0xd5c   : > { %4973 = vmatprep.subr.mxu1 %v5022_v37 }
 0xd5f   : > { %4974 = vmatpush3.xpose.msra.mxu1 %v5867_v25 }
 0xd60   : > { %4975 = vmatprep.subr.mxu1 %v5022_v37 }
 0xd63   : > { %4976 = vmatpush3.xpose.msra.mxu1 %v5863_v34 }
 0xd64   : > { %4977 = vmatprep.subr.mxu1 %v5022_v37 }
 0xd67   : > { %4978 = vmatpush3.xpose.msra.mxu1 %v5840_v57 }
 0xda1   : > { %v3738_v59 = vpop.permute.xlu0 %3737 }
 0xdea   : > { %v5998_v24 = vpop.f32.mrf.mxu1 }
 0xdeb   : > { %v3523_v44 = vadd.f32 %v5998_v24, %v4026_v45 }
 0xdec   : > { %v6000_v50 = vpop.f32.mrf.mxu1 }
 0xded   : > { %v3597_v60 = vmax.f32 %v3523_v44, 0.0  ;;  %v3518_v42 = vadd.f32 %v4026_v45, %v6000_v50 }
 0xdee   : > { %v4893_v51 = vpop.f32.mrf.mxu1 }
 0xdef   : > { %v3533_v27 = vadd.f32 %v4893_v51, %v4026_v45  ;;  %v3596_v61 = vmax.f32 %v3518_v42, 0.0 }
 0xdf0   : > { %v6002_v23 = vpop.f32.mrf.mxu1 }
 0xdf1   : > { %v3599_v26 = vmax.f32 %v3533_v27, 0.0  ;;  %v3528_v58 = vadd.f32 %v4026_v45, %v6002_v23 }
 0xdf2   : > { %v4896_v25 = vpop.f32.mrf.mxu1 }
 0xdf3   : > { %v3543_v31 = vadd.f32 %v4896_v25, %v4026_v45  ;;  %v3598_v43 = vmax.f32 %v3528_v58, 0.0 }
 0xdf4   : > { %v3537_v53 = vpop.f32.mrf.mxu1 }
 0xdf5   : > { %v3601_v32 = vmax.f32 %v3543_v31, 0.0  ;;  %v3538_v28 = vadd.f32 %v4026_v45, %v3537_v53 }
 0xdf6   : > { %v4899_v49 = vpop.f32.mrf.mxu1 }
 0xdf7   : > { %v3553_v20 = vadd.f32 %v4899_v49, %v4026_v45  ;;  %v3600_v33 = vmax.f32 %v3538_v28, 0.0 }
 0xdf8   : > { %v3547_v34 = vpop.f32.mrf.mxu1 }
 0xdf9   : > { %v3603_v22 = vmax.f32 %v3553_v20, 0.0  ;;  %v3548_v30 = vadd.f32 %v4026_v45, %v3547_v34 }
 0xdfa   : > { %v4902_v54 = vpop.f32.mrf.mxu1 }
 0xdfb   : > { %v3563_v7 = vadd.f32 %v4902_v54, %v4026_v45  ;;  %v3602_v29 = vmax.f32 %v3548_v30, 0.0 }
 0xdfc   : > { %v3557_v48 = vpop.f32.mrf.mxu1 }
 0xdfd   : > { %v3605_v17 = vmax.f32 %v3563_v7, 0.0  ;;  %v3558_v19 = vadd.f32 %v4026_v45, %v3557_v48 }
 0xdfe   : > { %v4905_v55 = vpop.f32.mrf.mxu1 }
 0xdff   : > { %v3573_v12 = vadd.f32 %v4905_v55, %v4026_v45  ;;  %v3604_v21 = vmax.f32 %v3558_v19, 0.0 }
 0xe00   : > { %v3567_v57 = vpop.f32.mrf.mxu1 }
 0xe01   : > { %v3607_v14 = vmax.f32 %v3573_v12, 0.0  ;;  %v3568_v15 = vadd.f32 %v4026_v45, %v3567_v57 }
 0xe02   : > { %v4908_v56 = vpop.f32.mrf.mxu1 }
 0xe03   : > { %v3583_v9 = vadd.f32 %v4908_v56, %v4026_v45  ;;  %v3606_v16 = vmax.f32 %v3568_v15, 0.0 }
 0xe04   : > { %v3577_v46 = vpop.f32.mrf.mxu1 }
 0xe05   : > { %v3609_v18 = vmax.f32 %v3583_v9, 0.0  ;;  %v3578_v11 = vadd.f32 %v4026_v45, %v3577_v46 }
 0xe06   : > { %v4911_v47 = vpop.f32.mrf.mxu1 }
 0xe07   : > { %v3593_v4 = vadd.f32 %v4911_v47, %v4026_v45  ;;  %v3608_v13 = vmax.f32 %v3578_v11, 0.0 }
 0xe08   : > { %v3587_v5 = vpop.f32.mrf.mxu1 }
 0xe09   : > { %v3611_v6 = vmax.f32 %v3593_v4, 0.0  ;;  %v3588_v8 = vadd.f32 %v4026_v45, %v3587_v5 }
 0xe0b   : > { %4913 = vmatpush3.xpose.msk.msra.mxu0 %vm1158_vm2, %v3611_v6  ;;  %v3610_v10 = vmax.f32 %v3588_v8, 0.0 }
 0xe0c   : > { %4914 = vmatprep.subr.mxu0 %v5022_v37 }
 0xe0f   : > { %4915 = vmatpush3.xpose.msk.msra.mxu0 %vm1158_vm2, %v3610_v10 }
 0xe10   : > { %4916 = vmatprep.subr.mxu0 %v5022_v37 }
 0xe13   : > { %4917 = vmatpush3.xpose.msk.msra.mxu0 %vm1158_vm2, %v3609_v18 }
 0xe14   : > { %4918 = vmatprep.subr.mxu0 %v5022_v37 }
 0xe17   : > { %4919 = vmatpush3.xpose.msk.msra.mxu0 %vm1158_vm2, %v3608_v13 }
 0xe18   : > { %4920 = vmatprep.subr.mxu0 %v5022_v37 }
 0xe1b   : > { %4921 = vmatpush3.xpose.msk.msra.mxu0 %vm1158_vm2, %v3607_v14 }
 0xe1c   : > { %4922 = vmatprep.subr.mxu0 %v5022_v37 }
 0xe1f   : > { %4923 = vmatpush3.xpose.msk.msra.mxu0 %vm1158_vm2, %v3606_v16 }
 0xe20   : > { %4924 = vmatprep.subr.mxu0 %v5022_v37 }
 0xe23   : > { %4925 = vmatpush3.xpose.msk.msra.mxu0 %vm1158_vm2, %v3605_v17 }
 0xe24   : > { %4926 = vmatprep.subr.mxu0 %v5022_v37 }
 0xe27   : > { %4927 = vmatpush3.xpose.msk.msra.mxu0 %vm1158_vm2, %v3604_v21 }
 0xe28   : > { %4928 = vmatprep.subr.mxu0 %v5022_v37 }
 0xe2b   : > { %4929 = vmatpush3.xpose.msk.msra.mxu0 %vm1158_vm2, %v3603_v22 }
 0xe2c   : > { %4930 = vmatprep.subr.mxu0 %v5022_v37 }
 0xe2f   : > { %4931 = vmatpush3.xpose.msk.msra.mxu0 %vm1158_vm2, %v3602_v29 }
 0xe30   : > { %4932 = vmatprep.subr.mxu0 %v5022_v37 }
 0xe33   : > { %4933 = vmatpush3.xpose.msk.msra.mxu0 %vm1158_vm2, %v3601_v32 }
 0xe34   : > { %4934 = vmatprep.subr.mxu0 %v5022_v37 }
 0xe37   : > { %4935 = vmatpush3.xpose.msk.msra.mxu0 %vm1158_vm2, %v3600_v33 }
 0xe38   : > { %4936 = vmatprep.subr.mxu0 %v5022_v37 }
 0xe3b   : > { %4937 = vmatpush3.xpose.msk.msra.mxu0 %vm1158_vm2, %v3599_v26 }
 0xe3c   : > { %4938 = vmatprep.subr.mxu0 %v5022_v37 }
 0xe3f   : > { %4939 = vmatpush3.xpose.msk.msra.mxu0 %vm1158_vm2, %v3598_v43 }
 0xe40   : > { %4940 = vmatprep.subr.mxu0 %v5022_v37 }
 0xe43   : > { %4941 = vmatpush3.xpose.msk.msra.mxu0 %vm1158_vm2, %v3597_v60 }
 0xe44   : > { %4942 = vmatprep.subr.mxu0 %v5022_v37  ;;  %v3742_v37 = vsub.s32 0, %v3741_v39 }
 0xe46   : > { %v3743_v52 = vrot.slane %v3738_v59, %v3742_v37 }
 0xe47   : > { %4943 = vmatpush3.xpose.msk.msra.mxu0 %vm1158_vm2, %v3596_v61 }
 0xe4a   : > { %4945 = vmatmul.mubr.msk.f32.vlgmr.msra.gmra.mxu0 %vm1158_vm2, %v3612_v41 }
 0xf0a   : > { %v3730_v38 = vpop.f32.mrf.mxu0 }
 0xf0b   : > { %4980 = vmatmul.mubr.f32.vlgmr.msra.gmra.mxu1 %v3730_v38 }
 0xf0c   : > { %v4946_v36 = vpop.f32.mrf.mxu0 }
 0xfcb   : > { %v3810_v63 = vpop.f32.mrf.mxu1 }
 0xfcc   : > { %v3811_v0 = vadd.f32 %v3810_v63, %v3743_v52 }
 0xfcd   : > { %v4981_v1 = vpop.f32.mrf.mxu1 }
 0xfce   : > { %v4044_v2 = vmul.f32 -1.442695, %v3811_v0 }
 0xfd0   : > { %4994 = vpow2.f32 %v4044_v2 }
 0xfdd   : > { %v4995_v3 = vpop.eup %4994 }
 0xfde   : > { %v3817_v24 = vadd.f32 1.0, %v4995_v3 }
 0xfe0   : > { %4996 = vrcp.f32 %v3817_v24 }
 0xfed   : > { %v4997_v50 = vpop.eup %4996 }
 0xfee   : > { %3820 = vst [vmem:[%s755_s3] sm:$0x1] %v4997_v50 }
 0xfef PF: > { %s36_s27 = sadd.s32 1, %s5020_s27  }
 0xff0   : > { %p33_p4 = scmp.ge.s32.totalorder %s36_s27, 4  }
 0xff2   :  { %35 = sbr.rel (!%p33_p4) target bundleno = 10 (0xa), region = 149 }

</bundles_post_ra>
